<compile_context>
chip_gen: v7x
topology: tpu7x:2x2x1
jax: 0.10.0
libtpu: 0.0.40
codegen_flags: <defaults>
</compile_context>

<pallas_src>
import numpy as np

import jax
import jax.numpy as jnp
from jax.experimental import pallas as pl
from jax.experimental.pallas import tpu as pltpu

N_ACTIONS = 2


# ------------------------------ fused kernel ------------------------------- #
def _dqnn_kernel(xe_ref, xo_ref, w1_ref, b1_ref, w2_ref, b2_ref,
                 fc1w_ref, fc1b_ref, fc2w_ref, fc2b_ref, o_ref):
    """Whole DQNN forward for one batch element; all intermediates stay in VMEM.

    Activations use a channels-last row layout [rows, width*channels], split by
    row parity so that both the stride-1 and the stride-2 conv become three
    contiguous-slice row-matmuls (no im2col, no strided slicing, no reshapes).
    """
    f32 = jnp.float32
    half = xe_ref.shape[1]            # = H // 2 (= conv2 output height)
    hidden = fc1b_ref.shape[-1]

    def bdot(a, w):                   # MXU matmul: bf16 operands, f32 accumulate
        return jnp.dot(a.astype(w.dtype), w, preferred_element_type=f32)

    xe = xe_ref[0]                    # input rows 0,2,4,...   [half, W*Cin] f32
    xo = xo_ref[0]                    # input rows 1,3,5,...   [half, W*Cin] f32

    # Rows of the height-padded input, split by parity: e[k]=pad[2k], o[k]=pad[2k+1].
    z1 = jnp.zeros((1, xe.shape[1]), f32)
    x1e = jnp.concatenate([z1, xo], axis=0)          # [half+1, W*Cin]
    x1o = jnp.concatenate([xe, z1], axis=0)

    # conv1 (3x3, s=1, p=1): width taps folded into w1 -> 3 matmuls per parity.
    b1 = b1_ref[...]
    o1e = (bdot(x1e[:half], w1_ref[0]) + bdot(x1o[:half], w1_ref[1])
           + bdot(x1e[1:half + 1], w1_ref[2]))       # even output rows [half, W*C1]
    o1o = (bdot(x1o[:half], w1_ref[0]) + bdot(x1e[1:half + 1], w1_ref[1])
           + bdot(x1o[1:half + 1], w1_ref[2]))       # odd output rows
    o1e = jnp.maximum(o1e + b1, 0.0)
    o1o = jnp.maximum(o1o + b1, 0.0)

    # conv2 (3x3, s=2, p=1): output row ho reads padded rows 2ho, 2ho+1, 2ho+2.
    z2 = jnp.zeros((1, o1e.shape[1]), f32)
    x2e = jnp.concatenate([z2, o1o], axis=0)         # [half+1, W*C1]
    x2o = jnp.concatenate([o1e, z2], axis=0)
    o2 = (bdot(x2e[:half], w2_ref[0]) + bdot(x2o[:half], w2_ref[1])
          + bdot(x2e[1:half + 1], w2_ref[2]))        # [half, Wo2*C2]
    o2 = jnp.maximum(o2 + b2_ref[...], 0.0)

    # fc1: torch flatten == one [1, Wo2*C2] x [Wo2*C2, hidden] matmul per row,
    # accumulated (avoids an in-kernel [half, Wo2*C2] -> [1, flat] reshape).
    acc = jnp.zeros((1, hidden), f32)
    for r in range(half):
        acc = acc + bdot(o2[r:r + 1, :], fc1w_ref[r])
    h1 = jnp.maximum(acc + fc1b_ref[...], 0.0)       # [1, hidden]

    # fc2, zero-padded to 128 output lanes for a single lane-dense store.
    o_ref[0] = bdot(h1, fc2w_ref[...]) + fc2b_ref[...]


# --------------------------- weight repacking ------------------------------ #
def _conv_row_weights(K, w_in, stride, pad):
    """Fold the width dimension of a conv into per-row band matrices.

    K: [Cout, Cin, kh, kw]  ->  M: [kh, w_in*Cin, Wo*Cout]  with
    M[di, wi*Cin + c, wo*Cout + co] = K[co, c, di, wi - stride*wo + pad]
    (out-of-range width taps == zero padding are simply dropped).
    """
    Cout, Cin, kh, kw = K.shape
    Wo = (w_in + 2 * pad - kw) // stride + 1
    Kt = np.transpose(K.astype(np.float32), (2, 3, 1, 0))   # [kh, kw, Cin, Cout]
    M = np.zeros((kh, w_in * Cin, Wo * Cout), np.float32)
    for di in range(kh):
        for wo in range(Wo):
            for dj in range(kw):
                wi = stride * wo + dj - pad
                if 0 <= wi < w_in:
                    M[di, wi * Cin:(wi + 1) * Cin, wo * Cout:(wo + 1) * Cout] = Kt[di, dj]
    return M


def prepare_params(params, h, w, n_pad=128):
    """One-time repack of PyTorch-layout params into the fused kernel's layout."""
    c1w = np.asarray(params["conv1_w"], np.float32) / 255.0   # fold x/255 into conv1
    c1b = np.asarray(params["conv1_b"], np.float32)
    c2w = np.asarray(params["conv2_w"], np.float32)
    c2b = np.asarray(params["conv2_b"], np.float32)
    f1w = np.asarray(params["fc1_w"], np.float32)
    f1b = np.asarray(params["fc1_b"], np.float32)
    f2w = np.asarray(params["fc2_w"], np.float32)
    f2b = np.asarray(params["fc2_b"], np.float32)

    C1, C2 = c1w.shape[0], c2w.shape[0]
    hidden, n_act = f2w.shape
    h2, w2 = h // 2, w // 2

    w1 = _conv_row_weights(c1w, w, stride=1, pad=1)           # [3, w*Cin,  w*C1]
    w2m = _conv_row_weights(c2w, w, stride=2, pad=1)          # [3, w*C1,  w2*C2]
    b1_row = np.tile(c1b, w).reshape(1, w * C1)
    b2_row = np.tile(c2b, w2).reshape(1, w2 * C2)

    # torch flatten of conv2 output [C2, h2, w2] -> our row layout [h2, w2*C2].
    f1w3 = f1w.reshape(C2, h2, w2, hidden).transpose(1, 2, 0, 3).reshape(h2, w2 * C2, hidden)

    f2w_pad = np.zeros((hidden, n_pad), np.float32)
    f2w_pad[:, :n_act] = f2w
    f2b_pad = np.zeros((1, n_pad), np.float32)
    f2b_pad[0, :n_act] = f2b

    bf = jnp.bfloat16
    return {
        "w1": jnp.asarray(w1, bf), "b1": jnp.asarray(b1_row, jnp.float32),
        "w2": jnp.asarray(w2m, bf), "b2": jnp.asarray(b2_row, jnp.float32),
        "fc1w": jnp.asarray(f1w3, bf), "fc1b": jnp.asarray(f1b.reshape(1, -1), jnp.float32),
        "fc2w": jnp.asarray(f2w_pad, bf), "fc2b": jnp.asarray(f2b_pad, jnp.float32),
    }


# ------------------------------- forward ----------------------------------- #
def dqnn_forward(kp, x):
    """DQNN.forward: x NCHW (float32 pixel values 0..255) -> Q-values [B, 2]."""
    B, Cin, H, W = x.shape
    assert H % 2 == 0 and W % 2 == 0
    half = H // 2
    n_pad = kp["fc2w"].shape[-1]

    # Only input-side glue: NCHW -> channels-last rows, split by row parity.
    xr = jnp.transpose(x.astype(jnp.float32), (0, 2, 3, 1)).reshape(B, H, W * Cin)
    x_even, x_odd = xr[:, 0::2, :], xr[:, 1::2, :]

    weight_order = ("w1", "b1", "w2", "b2", "fc1w", "fc1b", "fc2w", "fc2b")

    def full_spec(a):
        nd = a.ndim
        return pl.BlockSpec(a.shape, lambda b: (0,) * nd)     # grid-resident weights

    per_batch = pl.BlockSpec((1, half, W * Cin), lambda b: (b, 0, 0))

    flops = 2 * B * (3 * H * kp["w1"].shape[1] * kp["w1"].shape[2]
                     + 3 * half * kp["w2"].shape[1] * kp["w2"].shape[2]
                     + kp["fc1w"].size + kp["fc2w"].size)
    bytes_accessed = (x.size * 4 + B * n_pad * 4
                      + sum(int(kp[k].size) * kp[k].dtype.itemsize for k in weight_order))

    q_pad = pl.pallas_call(
        _dqnn_kernel,
        out_shape=jax.ShapeDtypeStruct((B, 1, n_pad), jnp.float32),
        grid=(B,),
        in_specs=[per_batch, per_batch] + [full_spec(kp[k]) for k in weight_order],
        out_specs=pl.BlockSpec((1, 1, n_pad), lambda b: (b, 0, 0)),
        compiler_params=pltpu.CompilerParams(
            dimension_semantics=("parallel",),
            vmem_limit_bytes=32 * 1024 * 1024),
        cost_estimate=pl.CostEstimate(flops=int(flops), transcendentals=0,
                                      bytes_accessed=int(bytes_accessed)),
    )(x_even, x_odd, *[kp[k] for k in weight_order])

    return q_pad[:, 0, :N_ACTIONS]


# ------------------------------ model setup -------------------------------- #
def init_params(key, sequence_n, h, w, n_actions=N_ACTIONS, hidden=64):
    ks = jax.random.split(key, 8)

    def uni(k, shape, fan_in):
        bound = 1.0 / jnp.sqrt(fan_in)
        return jax.random.uniform(k, shape, jnp.float32, -bound, bound)

    c1_out, c2_out = 16, 32
    flat = c2_out * (h // 2) * (w // 2)
    return {
        "conv1_w": uni(ks[0], (c1_out, sequence_n, 3, 3), sequence_n * 9),
        "conv1_b": uni(ks[1], (c1_out,), sequence_n * 9),
        "conv2_w": uni(ks[2], (c2_out, c1_out, 3, 3), c1_out * 9),
        "conv2_b": uni(ks[3], (c2_out,), c1_out * 9),
        "fc1_w": uni(ks[4], (flat, hidden), flat),
        "fc1_b": uni(ks[5], (hidden,), flat),
        "fc2_w": uni(ks[6], (hidden, n_actions), hidden),
        "fc2_b": uni(ks[7], (n_actions,), hidden),
    }


def dqnn_reference(params, x):
    """Pure-JAX (f32) reference of the same forward, for verification."""
    x = x.astype(jnp.float32) / 255.0
    dn = ("NCHW", "OIHW", "NCHW")
    y = jax.lax.conv_general_dilated(x, params["conv1_w"], (1, 1), ((1, 1), (1, 1)),
                                     dimension_numbers=dn)
    y = jnp.maximum(y + params["conv1_b"].reshape(1, -1, 1, 1), 0.0)
    y = jax.lax.conv_general_dilated(y, params["conv2_w"], (2, 2), ((1, 1), (1, 1)),
                                     dimension_numbers=dn)
    y = jnp.maximum(y + params["conv2_b"].reshape(1, -1, 1, 1), 0.0)
    y = y.reshape(x.shape[0], -1)
    y = jnp.maximum(y @ params["fc1_w"] + params["fc1_b"], 0.0)
    return y @ params["fc2_w"] + params["fc2_b"]


# ---------------------------------- main ----------------------------------- #
if __name__ == "__main__":
    key = jax.random.PRNGKey(0)
    k_x, k_p = jax.random.split(key)

    B, seq_n, H, W = 2, 4, 16, 16
    # Raw uint8-style pixel values as float32 (what the env would hand in).
    x = jax.random.randint(k_x, (B, seq_n, H, W), 0, 256).astype(jnp.float32)

    params = init_params(k_p, seq_n, H, W)
    kparams = prepare_params(params, H, W)          # one-time weight repack

    fwd = jax.jit(dqnn_forward)
    q = jax.block_until_ready(fwd(kparams, x))

    assert q.shape == (B, N_ACTIONS) and q.dtype == jnp.float32
    q_ref = dqnn_reference(params, x)
    assert bool(jnp.allclose(q, q_ref, rtol=5e-2, atol=5e-2)), (q, q_ref)
    print("KERNEL_OK")
</pallas_src>

<mosaic_0001>
module attributes {stable_mosaic.version = 11 : i64} {
  func.func @_dqnn_kernel(%arg0: i32, %arg1: memref<1x8x64xf32, #tpu.memory_space<vmem>>, %arg2: memref<1x8x64xf32, #tpu.memory_space<vmem>>, %arg3: memref<3x64x256xbf16, #tpu.memory_space<vmem>>, %arg4: memref<1x256xf32, #tpu.memory_space<vmem>>, %arg5: memref<3x256x256xbf16, #tpu.memory_space<vmem>>, %arg6: memref<1x256xf32, #tpu.memory_space<vmem>>, %arg7: memref<8x256x64xbf16, #tpu.memory_space<vmem>>, %arg8: memref<1x64xf32, #tpu.memory_space<vmem>>, %arg9: memref<64x128xbf16, #tpu.memory_space<vmem>>, %arg10: memref<1x128xf32, #tpu.memory_space<vmem>>, %arg11: memref<1x1x128xf32, #tpu.memory_space<vmem>>) attributes {dimension_semantics = [#tpu.dimension_semantics<parallel>], iteration_bounds = array<i64: 2>, scalar_prefetch = 0 : i64, scratch_operands = 0 : i64, tpu.core_type = #tpu.core_type<tc>, window_params = [{transform_indices = @transform_0, window_bounds = array<i64: 1, 8, 64>}, {transform_indices = @transform_1, window_bounds = array<i64: 1, 8, 64>}, {pipeline_mode = #tpu.pipeline_mode<synchronous>, transform_indices = @transform_2, window_bounds = array<i64: 3, 64, 256>}, {pipeline_mode = #tpu.pipeline_mode<synchronous>, transform_indices = @transform_3, window_bounds = array<i64: 1, 256>}, {pipeline_mode = #tpu.pipeline_mode<synchronous>, transform_indices = @transform_4, window_bounds = array<i64: 3, 256, 256>}, {pipeline_mode = #tpu.pipeline_mode<synchronous>, transform_indices = @transform_5, window_bounds = array<i64: 1, 256>}, {pipeline_mode = #tpu.pipeline_mode<synchronous>, transform_indices = @transform_6, window_bounds = array<i64: 8, 256, 64>}, {pipeline_mode = #tpu.pipeline_mode<synchronous>, transform_indices = @transform_7, window_bounds = array<i64: 1, 64>}, {pipeline_mode = #tpu.pipeline_mode<synchronous>, transform_indices = @transform_8, window_bounds = array<i64: 64, 128>}, {pipeline_mode = #tpu.pipeline_mode<synchronous>, transform_indices = @transform_9, window_bounds = array<i64: 1, 128>}, {transform_indices = @transform_10, window_bounds = array<i64: 1, 1, 128>}]} {
    %c0 = arith.constant 0 : index
    %c0_0 = arith.constant 0 : index
    %c0_1 = arith.constant 0 : index
    %0 = vector.load %arg1[%c0, %c0_0, %c0_1] : memref<1x8x64xf32, #tpu.memory_space<vmem>>, vector<1x8x64xf32>
    %1 = vector.shape_cast %0 : vector<1x8x64xf32> to vector<8x64xf32>
    %c0_2 = arith.constant 0 : index
    %c0_3 = arith.constant 0 : index
    %c0_4 = arith.constant 0 : index
    %2 = vector.load %arg2[%c0_2, %c0_3, %c0_4] : memref<1x8x64xf32, #tpu.memory_space<vmem>>, vector<1x8x64xf32>
    %3 = vector.shape_cast %2 : vector<1x8x64xf32> to vector<8x64xf32>
    %cst = arith.constant 0.000000e+00 : f32
    %4 = vector.broadcast %cst : f32 to vector<1x64xf32>
    %5 = tpu.concatenate %4, %3 in 0 : vector<1x64xf32>, vector<8x64xf32> -> vector<9x64xf32>
    %6 = tpu.concatenate %1, %4 in 0 : vector<8x64xf32>, vector<1x64xf32> -> vector<9x64xf32>
    %c0_5 = arith.constant 0 : index
    %c0_6 = arith.constant 0 : index
    %7 = vector.load %arg4[%c0_5, %c0_6] : memref<1x256xf32, #tpu.memory_space<vmem>>, vector<1x256xf32>
    %8 = vector.extract_strided_slice %5 {offsets = [0, 0], sizes = [8, 64], strides = [1, 1]} : vector<9x64xf32> to vector<8x64xf32>
    %c0_7 = arith.constant 0 : index
    %c0_8 = arith.constant 0 : index
    %c0_9 = arith.constant 0 : index
    %9 = vector.load %arg3[%c0_7, %c0_8, %c0_9] : memref<3x64x256xbf16, #tpu.memory_space<vmem>>, vector<1x64x256xbf16>
    %10 = vector.shape_cast %9 : vector<1x64x256xbf16> to vector<64x256xbf16>
    %11 = arith.truncf %8 : vector<8x64xf32> to vector<8x64xbf16>
    %cst_10 = arith.constant dense<0.000000e+00> : vector<8x256xf32>
    %12 = tpu.matmul %11, %10, %cst_10 {dimension_numbers = #tpu.dot_dimension_numbers<[1], [0], [0], [1], [0, 0, 1, 1], [], []>} : vector<8x64xbf16>, vector<64x256xbf16>, vector<8x256xf32> -> vector<8x256xf32>
    %13 = vector.extract_strided_slice %6 {offsets = [0, 0], sizes = [8, 64], strides = [1, 1]} : vector<9x64xf32> to vector<8x64xf32>
    %c1 = arith.constant 1 : index
    %c0_11 = arith.constant 0 : index
    %c0_12 = arith.constant 0 : index
    %14 = vector.load %arg3[%c1, %c0_11, %c0_12] : memref<3x64x256xbf16, #tpu.memory_space<vmem>>, vector<1x64x256xbf16>
    %15 = vector.shape_cast %14 : vector<1x64x256xbf16> to vector<64x256xbf16>
    %16 = arith.truncf %13 : vector<8x64xf32> to vector<8x64xbf16>
    %cst_13 = arith.constant dense<0.000000e+00> : vector<8x256xf32>
    %17 = tpu.matmul %16, %15, %cst_13 {dimension_numbers = #tpu.dot_dimension_numbers<[1], [0], [0], [1], [0, 0, 1, 1], [], []>} : vector<8x64xbf16>, vector<64x256xbf16>, vector<8x256xf32> -> vector<8x256xf32>
    %18 = arith.addf %12, %17 : vector<8x256xf32>
    %19 = vector.extract_strided_slice %5 {offsets = [1, 0], sizes = [8, 64], strides = [1, 1]} : vector<9x64xf32> to vector<8x64xf32>
    %c2 = arith.constant 2 : index
    %c0_14 = arith.constant 0 : index
    %c0_15 = arith.constant 0 : index
    %20 = vector.load %arg3[%c2, %c0_14, %c0_15] : memref<3x64x256xbf16, #tpu.memory_space<vmem>>, vector<1x64x256xbf16>
    %21 = vector.shape_cast %20 : vector<1x64x256xbf16> to vector<64x256xbf16>
    %22 = arith.truncf %19 : vector<8x64xf32> to vector<8x64xbf16>
    %cst_16 = arith.constant dense<0.000000e+00> : vector<8x256xf32>
    %23 = tpu.matmul %22, %21, %cst_16 {dimension_numbers = #tpu.dot_dimension_numbers<[1], [0], [0], [1], [0, 0, 1, 1], [], []>} : vector<8x64xbf16>, vector<64x256xbf16>, vector<8x256xf32> -> vector<8x256xf32>
    %24 = arith.addf %18, %23 : vector<8x256xf32>
    %25 = vector.extract_strided_slice %6 {offsets = [0, 0], sizes = [8, 64], strides = [1, 1]} : vector<9x64xf32> to vector<8x64xf32>
    %c0_17 = arith.constant 0 : index
    %c0_18 = arith.constant 0 : index
    %c0_19 = arith.constant 0 : index
    %26 = vector.load %arg3[%c0_17, %c0_18, %c0_19] : memref<3x64x256xbf16, #tpu.memory_space<vmem>>, vector<1x64x256xbf16>
    %27 = vector.shape_cast %26 : vector<1x64x256xbf16> to vector<64x256xbf16>
    %28 = arith.truncf %25 : vector<8x64xf32> to vector<8x64xbf16>
    %cst_20 = arith.constant dense<0.000000e+00> : vector<8x256xf32>
    %29 = tpu.matmul %28, %27, %cst_20 {dimension_numbers = #tpu.dot_dimension_numbers<[1], [0], [0], [1], [0, 0, 1, 1], [], []>} : vector<8x64xbf16>, vector<64x256xbf16>, vector<8x256xf32> -> vector<8x256xf32>
    %30 = vector.extract_strided_slice %5 {offsets = [1, 0], sizes = [8, 64], strides = [1, 1]} : vector<9x64xf32> to vector<8x64xf32>
    %c1_21 = arith.constant 1 : index
    %c0_22 = arith.constant 0 : index
    %c0_23 = arith.constant 0 : index
    %31 = vector.load %arg3[%c1_21, %c0_22, %c0_23] : memref<3x64x256xbf16, #tpu.memory_space<vmem>>, vector<1x64x256xbf16>
    %32 = vector.shape_cast %31 : vector<1x64x256xbf16> to vector<64x256xbf16>
    %33 = arith.truncf %30 : vector<8x64xf32> to vector<8x64xbf16>
    %cst_24 = arith.constant dense<0.000000e+00> : vector<8x256xf32>
    %34 = tpu.matmul %33, %32, %cst_24 {dimension_numbers = #tpu.dot_dimension_numbers<[1], [0], [0], [1], [0, 0, 1, 1], [], []>} : vector<8x64xbf16>, vector<64x256xbf16>, vector<8x256xf32> -> vector<8x256xf32>
    %35 = arith.addf %29, %34 : vector<8x256xf32>
    %36 = vector.extract_strided_slice %6 {offsets = [1, 0], sizes = [8, 64], strides = [1, 1]} : vector<9x64xf32> to vector<8x64xf32>
    %c2_25 = arith.constant 2 : index
    %c0_26 = arith.constant 0 : index
    %c0_27 = arith.constant 0 : index
    %37 = vector.load %arg3[%c2_25, %c0_26, %c0_27] : memref<3x64x256xbf16, #tpu.memory_space<vmem>>, vector<1x64x256xbf16>
    %38 = vector.shape_cast %37 : vector<1x64x256xbf16> to vector<64x256xbf16>
    %39 = arith.truncf %36 : vector<8x64xf32> to vector<8x64xbf16>
    %cst_28 = arith.constant dense<0.000000e+00> : vector<8x256xf32>
    %40 = tpu.matmul %39, %38, %cst_28 {dimension_numbers = #tpu.dot_dimension_numbers<[1], [0], [0], [1], [0, 0, 1, 1], [], []>} : vector<8x64xbf16>, vector<64x256xbf16>, vector<8x256xf32> -> vector<8x256xf32>
    %41 = arith.addf %35, %40 : vector<8x256xf32>
    %42 = vector.broadcast %7 : vector<1x256xf32> to vector<8x256xf32>
    %43 = arith.addf %24, %42 : vector<8x256xf32>
    %cst_29 = arith.constant 0.000000e+00 : f32
    %44 = vector.broadcast %cst_29 : f32 to vector<8x256xf32>
    %45 = arith.maximumf %43, %44 : vector<8x256xf32>
    %46 = vector.broadcast %7 : vector<1x256xf32> to vector<8x256xf32>
    %47 = arith.addf %41, %46 : vector<8x256xf32>
    %cst_30 = arith.constant 0.000000e+00 : f32
    %48 = vector.broadcast %cst_30 : f32 to vector<8x256xf32>
    %49 = arith.maximumf %47, %48 : vector<8x256xf32>
    %cst_31 = arith.constant 0.000000e+00 : f32
    %50 = vector.broadcast %cst_31 : f32 to vector<1x256xf32>
    %51 = tpu.concatenate %50, %49 in 0 : vector<1x256xf32>, vector<8x256xf32> -> vector<9x256xf32>
    %52 = tpu.concatenate %45, %50 in 0 : vector<8x256xf32>, vector<1x256xf32> -> vector<9x256xf32>
    %53 = vector.extract_strided_slice %51 {offsets = [0, 0], sizes = [8, 256], strides = [1, 1]} : vector<9x256xf32> to vector<8x256xf32>
    %c0_32 = arith.constant 0 : index
    %c0_33 = arith.constant 0 : index
    %c0_34 = arith.constant 0 : index
    %54 = vector.load %arg5[%c0_32, %c0_33, %c0_34] : memref<3x256x256xbf16, #tpu.memory_space<vmem>>, vector<1x256x256xbf16>
    %55 = vector.shape_cast %54 : vector<1x256x256xbf16> to vector<256x256xbf16>
    %56 = arith.truncf %53 : vector<8x256xf32> to vector<8x256xbf16>
    %cst_35 = arith.constant dense<0.000000e+00> : vector<8x256xf32>
    %57 = tpu.matmul %56, %55, %cst_35 {dimension_numbers = #tpu.dot_dimension_numbers<[1], [0], [0], [1], [0, 0, 1, 1], [], []>} : vector<8x256xbf16>, vector<256x256xbf16>, vector<8x256xf32> -> vector<8x256xf32>
    %58 = vector.extract_strided_slice %52 {offsets = [0, 0], sizes = [8, 256], strides = [1, 1]} : vector<9x256xf32> to vector<8x256xf32>
    %c1_36 = arith.constant 1 : index
    %c0_37 = arith.constant 0 : index
    %c0_38 = arith.constant 0 : index
    %59 = vector.load %arg5[%c1_36, %c0_37, %c0_38] : memref<3x256x256xbf16, #tpu.memory_space<vmem>>, vector<1x256x256xbf16>
    %60 = vector.shape_cast %59 : vector<1x256x256xbf16> to vector<256x256xbf16>
    %61 = arith.truncf %58 : vector<8x256xf32> to vector<8x256xbf16>
    %cst_39 = arith.constant dense<0.000000e+00> : vector<8x256xf32>
    %62 = tpu.matmul %61, %60, %cst_39 {dimension_numbers = #tpu.dot_dimension_numbers<[1], [0], [0], [1], [0, 0, 1, 1], [], []>} : vector<8x256xbf16>, vector<256x256xbf16>, vector<8x256xf32> -> vector<8x256xf32>
    %63 = arith.addf %57, %62 : vector<8x256xf32>
    %64 = vector.extract_strided_slice %51 {offsets = [1, 0], sizes = [8, 256], strides = [1, 1]} : vector<9x256xf32> to vector<8x256xf32>
    %c2_40 = arith.constant 2 : index
    %c0_41 = arith.constant 0 : index
    %c0_42 = arith.constant 0 : index
    %65 = vector.load %arg5[%c2_40, %c0_41, %c0_42] : memref<3x256x256xbf16, #tpu.memory_space<vmem>>, vector<1x256x256xbf16>
    %66 = vector.shape_cast %65 : vector<1x256x256xbf16> to vector<256x256xbf16>
    %67 = arith.truncf %64 : vector<8x256xf32> to vector<8x256xbf16>
    %cst_43 = arith.constant dense<0.000000e+00> : vector<8x256xf32>
    %68 = tpu.matmul %67, %66, %cst_43 {dimension_numbers = #tpu.dot_dimension_numbers<[1], [0], [0], [1], [0, 0, 1, 1], [], []>} : vector<8x256xbf16>, vector<256x256xbf16>, vector<8x256xf32> -> vector<8x256xf32>
    %69 = arith.addf %63, %68 : vector<8x256xf32>
    %c0_44 = arith.constant 0 : index
    %c0_45 = arith.constant 0 : index
    %70 = vector.load %arg6[%c0_44, %c0_45] : memref<1x256xf32, #tpu.memory_space<vmem>>, vector<1x256xf32>
    %71 = vector.broadcast %70 : vector<1x256xf32> to vector<8x256xf32>
    %72 = arith.addf %69, %71 : vector<8x256xf32>
    %cst_46 = arith.constant 0.000000e+00 : f32
    %73 = vector.broadcast %cst_46 : f32 to vector<8x256xf32>
    %74 = arith.maximumf %72, %73 : vector<8x256xf32>
    %cst_47 = arith.constant 0.000000e+00 : f32
    %75 = vector.broadcast %cst_47 : f32 to vector<1x64xf32>
    %76 = vector.extract_strided_slice %74 {offsets = [0, 0], sizes = [1, 256], strides = [1, 1]} : vector<8x256xf32> to vector<1x256xf32>
    %c0_48 = arith.constant 0 : index
    %c0_49 = arith.constant 0 : index
    %c0_50 = arith.constant 0 : index
    %77 = vector.load %arg7[%c0_48, %c0_49, %c0_50] : memref<8x256x64xbf16, #tpu.memory_space<vmem>>, vector<1x256x64xbf16>
    %78 = vector.shape_cast %77 : vector<1x256x64xbf16> to vector<256x64xbf16>
    %79 = arith.truncf %76 : vector<1x256xf32> to vector<1x256xbf16>
    %cst_51 = arith.constant dense<0.000000e+00> : vector<1x64xf32>
    %80 = tpu.matmul %79, %78, %cst_51 {dimension_numbers = #tpu.dot_dimension_numbers<[1], [0], [0], [1], [0, 0, 1, 1], [], []>} : vector<1x256xbf16>, vector<256x64xbf16>, vector<1x64xf32> -> vector<1x64xf32>
    %81 = arith.addf %75, %80 : vector<1x64xf32>
    %82 = vector.extract_strided_slice %74 {offsets = [1, 0], sizes = [1, 256], strides = [1, 1]} : vector<8x256xf32> to vector<1x256xf32>
    %c1_52 = arith.constant 1 : index
    %c0_53 = arith.constant 0 : index
    %c0_54 = arith.constant 0 : index
    %83 = vector.load %arg7[%c1_52, %c0_53, %c0_54] : memref<8x256x64xbf16, #tpu.memory_space<vmem>>, vector<1x256x64xbf16>
    %84 = vector.shape_cast %83 : vector<1x256x64xbf16> to vector<256x64xbf16>
    %85 = arith.truncf %82 : vector<1x256xf32> to vector<1x256xbf16>
    %cst_55 = arith.constant dense<0.000000e+00> : vector<1x64xf32>
    %86 = tpu.matmul %85, %84, %cst_55 {dimension_numbers = #tpu.dot_dimension_numbers<[1], [0], [0], [1], [0, 0, 1, 1], [], []>} : vector<1x256xbf16>, vector<256x64xbf16>, vector<1x64xf32> -> vector<1x64xf32>
    %87 = arith.addf %81, %86 : vector<1x64xf32>
    %88 = vector.extract_strided_slice %74 {offsets = [2, 0], sizes = [1, 256], strides = [1, 1]} : vector<8x256xf32> to vector<1x256xf32>
    %c2_56 = arith.constant 2 : index
    %c0_57 = arith.constant 0 : index
    %c0_58 = arith.constant 0 : index
    %89 = vector.load %arg7[%c2_56, %c0_57, %c0_58] : memref<8x256x64xbf16, #tpu.memory_space<vmem>>, vector<1x256x64xbf16>
    %90 = vector.shape_cast %89 : vector<1x256x64xbf16> to vector<256x64xbf16>
    %91 = arith.truncf %88 : vector<1x256xf32> to vector<1x256xbf16>
    %cst_59 = arith.constant dense<0.000000e+00> : vector<1x64xf32>
    %92 = tpu.matmul %91, %90, %cst_59 {dimension_numbers = #tpu.dot_dimension_numbers<[1], [0], [0], [1], [0, 0, 1, 1], [], []>} : vector<1x256xbf16>, vector<256x64xbf16>, vector<1x64xf32> -> vector<1x64xf32>
    %93 = arith.addf %87, %92 : vector<1x64xf32>
    %94 = vector.extract_strided_slice %74 {offsets = [3, 0], sizes = [1, 256], strides = [1, 1]} : vector<8x256xf32> to vector<1x256xf32>
    %c3 = arith.constant 3 : index
    %c0_60 = arith.constant 0 : index
    %c0_61 = arith.constant 0 : index
    %95 = vector.load %arg7[%c3, %c0_60, %c0_61] : memref<8x256x64xbf16, #tpu.memory_space<vmem>>, vector<1x256x64xbf16>
    %96 = vector.shape_cast %95 : vector<1x256x64xbf16> to vector<256x64xbf16>
    %97 = arith.truncf %94 : vector<1x256xf32> to vector<1x256xbf16>
    %cst_62 = arith.constant dense<0.000000e+00> : vector<1x64xf32>
    %98 = tpu.matmul %97, %96, %cst_62 {dimension_numbers = #tpu.dot_dimension_numbers<[1], [0], [0], [1], [0, 0, 1, 1], [], []>} : vector<1x256xbf16>, vector<256x64xbf16>, vector<1x64xf32> -> vector<1x64xf32>
    %99 = arith.addf %93, %98 : vector<1x64xf32>
    %100 = vector.extract_strided_slice %74 {offsets = [4, 0], sizes = [1, 256], strides = [1, 1]} : vector<8x256xf32> to vector<1x256xf32>
    %c4 = arith.constant 4 : index
    %c0_63 = arith.constant 0 : index
    %c0_64 = arith.constant 0 : index
    %101 = vector.load %arg7[%c4, %c0_63, %c0_64] : memref<8x256x64xbf16, #tpu.memory_space<vmem>>, vector<1x256x64xbf16>
    %102 = vector.shape_cast %101 : vector<1x256x64xbf16> to vector<256x64xbf16>
    %103 = arith.truncf %100 : vector<1x256xf32> to vector<1x256xbf16>
    %cst_65 = arith.constant dense<0.000000e+00> : vector<1x64xf32>
    %104 = tpu.matmul %103, %102, %cst_65 {dimension_numbers = #tpu.dot_dimension_numbers<[1], [0], [0], [1], [0, 0, 1, 1], [], []>} : vector<1x256xbf16>, vector<256x64xbf16>, vector<1x64xf32> -> vector<1x64xf32>
    %105 = arith.addf %99, %104 : vector<1x64xf32>
    %106 = vector.extract_strided_slice %74 {offsets = [5, 0], sizes = [1, 256], strides = [1, 1]} : vector<8x256xf32> to vector<1x256xf32>
    %c5 = arith.constant 5 : index
    %c0_66 = arith.constant 0 : index
    %c0_67 = arith.constant 0 : index
    %107 = vector.load %arg7[%c5, %c0_66, %c0_67] : memref<8x256x64xbf16, #tpu.memory_space<vmem>>, vector<1x256x64xbf16>
    %108 = vector.shape_cast %107 : vector<1x256x64xbf16> to vector<256x64xbf16>
    %109 = arith.truncf %106 : vector<1x256xf32> to vector<1x256xbf16>
    %cst_68 = arith.constant dense<0.000000e+00> : vector<1x64xf32>
    %110 = tpu.matmul %109, %108, %cst_68 {dimension_numbers = #tpu.dot_dimension_numbers<[1], [0], [0], [1], [0, 0, 1, 1], [], []>} : vector<1x256xbf16>, vector<256x64xbf16>, vector<1x64xf32> -> vector<1x64xf32>
    %111 = arith.addf %105, %110 : vector<1x64xf32>
    %112 = vector.extract_strided_slice %74 {offsets = [6, 0], sizes = [1, 256], strides = [1, 1]} : vector<8x256xf32> to vector<1x256xf32>
    %c6 = arith.constant 6 : index
    %c0_69 = arith.constant 0 : index
    %c0_70 = arith.constant 0 : index
    %113 = vector.load %arg7[%c6, %c0_69, %c0_70] : memref<8x256x64xbf16, #tpu.memory_space<vmem>>, vector<1x256x64xbf16>
    %114 = vector.shape_cast %113 : vector<1x256x64xbf16> to vector<256x64xbf16>
    %115 = arith.truncf %112 : vector<1x256xf32> to vector<1x256xbf16>
    %cst_71 = arith.constant dense<0.000000e+00> : vector<1x64xf32>
    %116 = tpu.matmul %115, %114, %cst_71 {dimension_numbers = #tpu.dot_dimension_numbers<[1], [0], [0], [1], [0, 0, 1, 1], [], []>} : vector<1x256xbf16>, vector<256x64xbf16>, vector<1x64xf32> -> vector<1x64xf32>
    %117 = arith.addf %111, %116 : vector<1x64xf32>
    %118 = vector.extract_strided_slice %74 {offsets = [7, 0], sizes = [1, 256], strides = [1, 1]} : vector<8x256xf32> to vector<1x256xf32>
    %c7 = arith.constant 7 : index
    %c0_72 = arith.constant 0 : index
    %c0_73 = arith.constant 0 : index
    %119 = vector.load %arg7[%c7, %c0_72, %c0_73] : memref<8x256x64xbf16, #tpu.memory_space<vmem>>, vector<1x256x64xbf16>
    %120 = vector.shape_cast %119 : vector<1x256x64xbf16> to vector<256x64xbf16>
    %121 = arith.truncf %118 : vector<1x256xf32> to vector<1x256xbf16>
    %cst_74 = arith.constant dense<0.000000e+00> : vector<1x64xf32>
    %122 = tpu.matmul %121, %120, %cst_74 {dimension_numbers = #tpu.dot_dimension_numbers<[1], [0], [0], [1], [0, 0, 1, 1], [], []>} : vector<1x256xbf16>, vector<256x64xbf16>, vector<1x64xf32> -> vector<1x64xf32>
    %123 = arith.addf %117, %122 : vector<1x64xf32>
    %c0_75 = arith.constant 0 : index
    %c0_76 = arith.constant 0 : index
    %124 = vector.load %arg8[%c0_75, %c0_76] : memref<1x64xf32, #tpu.memory_space<vmem>>, vector<1x64xf32>
    %125 = arith.addf %123, %124 : vector<1x64xf32>
    %cst_77 = arith.constant 0.000000e+00 : f32
    %126 = vector.broadcast %cst_77 : f32 to vector<1x64xf32>
    %127 = arith.maximumf %125, %126 : vector<1x64xf32>
    %c0_78 = arith.constant 0 : index
    %c0_79 = arith.constant 0 : index
    %128 = vector.load %arg9[%c0_78, %c0_79] : memref<64x128xbf16, #tpu.memory_space<vmem>>, vector<64x128xbf16>
    %129 = arith.truncf %127 : vector<1x64xf32> to vector<1x64xbf16>
    %cst_80 = arith.constant dense<0.000000e+00> : vector<1x128xf32>
    %130 = tpu.matmul %129, %128, %cst_80 {dimension_numbers = #tpu.dot_dimension_numbers<[1], [0], [0], [1], [0, 0, 1, 1], [], []>} : vector<1x64xbf16>, vector<64x128xbf16>, vector<1x128xf32> -> vector<1x128xf32>
    %c0_81 = arith.constant 0 : index
    %c0_82 = arith.constant 0 : index
    %131 = vector.load %arg10[%c0_81, %c0_82] : memref<1x128xf32, #tpu.memory_space<vmem>>, vector<1x128xf32>
    %132 = arith.addf %130, %131 : vector<1x128xf32>
    %c0_83 = arith.constant 0 : index
    %c0_84 = arith.constant 0 : index
    %c0_85 = arith.constant 0 : index
    %133 = vector.load %arg11[%c0_83, %c0_84, %c0_85] : memref<1x1x128xf32, #tpu.memory_space<vmem>>, vector<1x1x128xf32>
    %134 = vector.shape_cast %133 : vector<1x1x128xf32> to vector<1x128xf32>
    %135 = vector.shape_cast %132 : vector<1x128xf32> to vector<1x1x128xf32>
    tpu.vector_store %arg11[%c0_83, %c0_84, %c0_85], %135 {strides = array<i32>} : memref<1x1x128xf32, #tpu.memory_space<vmem>>, vector<1x1x128xf32>,
    return
  }
  func.func @transform_0(%arg0: i32) -> (i32, i32, i32) {
    %c0_i32 = arith.constant 0 : i32
    %c0_i32_0 = arith.constant 0 : i32
    %c0_i32_1 = arith.constant 0 : i32
    return %arg0, %c0_i32, %c0_i32_0 : i32, i32, i32
  }
  func.func @transform_1(%arg0: i32) -> (i32, i32, i32) {
    %c0_i32 = arith.constant 0 : i32
    %c0_i32_0 = arith.constant 0 : i32
    %c0_i32_1 = arith.constant 0 : i32
    return %arg0, %c0_i32, %c0_i32_0 : i32, i32, i32
  }
  func.func @transform_2(%arg0: i32) -> (i32, i32, i32) {
    %c0_i32 = arith.constant 0 : i32
    %c0_i32_0 = arith.constant 0 : i32
    %c0_i32_1 = arith.constant 0 : i32
    %c0_i32_2 = arith.constant 0 : i32
    return %c0_i32, %c0_i32_0, %c0_i32_1 : i32, i32, i32
  }
  func.func @transform_3(%arg0: i32) -> (i32, i32) {
    %c0_i32 = arith.constant 0 : i32
    %c0_i32_0 = arith.constant 0 : i32
    %c0_i32_1 = arith.constant 0 : i32
    return %c0_i32, %c0_i32_0 : i32, i32
  }
  func.func @transform_4(%arg0: i32) -> (i32, i32, i32) {
    %c0_i32 = arith.constant 0 : i32
    %c0_i32_0 = arith.constant 0 : i32
    %c0_i32_1 = arith.constant 0 : i32
    %c0_i32_2 = arith.constant 0 : i32
    return %c0_i32, %c0_i32_0, %c0_i32_1 : i32, i32, i32
  }
  func.func @transform_5(%arg0: i32) -> (i32, i32) {
    %c0_i32 = arith.constant 0 : i32
    %c0_i32_0 = arith.constant 0 : i32
    %c0_i32_1 = arith.constant 0 : i32
    return %c0_i32, %c0_i32_0 : i32, i32
  }
  func.func @transform_6(%arg0: i32) -> (i32, i32, i32) {
    %c0_i32 = arith.constant 0 : i32
    %c0_i32_0 = arith.constant 0 : i32
    %c0_i32_1 = arith.constant 0 : i32
    %c0_i32_2 = arith.constant 0 : i32
    return %c0_i32, %c0_i32_0, %c0_i32_1 : i32, i32, i32
  }
  func.func @transform_7(%arg0: i32) -> (i32, i32) {
    %c0_i32 = arith.constant 0 : i32
    %c0_i32_0 = arith.constant 0 : i32
    %c0_i32_1 = arith.constant 0 : i32
    return %c0_i32, %c0_i32_0 : i32, i32
  }
  func.func @transform_8(%arg0: i32) -> (i32, i32) {
    %c0_i32 = arith.constant 0 : i32
    %c0_i32_0 = arith.constant 0 : i32
    %c0_i32_1 = arith.constant 0 : i32
    return %c0_i32, %c0_i32_0 : i32, i32
  }
  func.func @transform_9(%arg0: i32) -> (i32, i32) {
    %c0_i32 = arith.constant 0 : i32
    %c0_i32_0 = arith.constant 0 : i32
    %c0_i32_1 = arith.constant 0 : i32
    return %c0_i32, %c0_i32_0 : i32, i32
  }
  func.func @transform_10(%arg0: i32) -> (i32, i32, i32) {
    %c0_i32 = arith.constant 0 : i32
    %c0_i32_0 = arith.constant 0 : i32
    %c0_i32_1 = arith.constant 0 : i32
    return %arg0, %c0_i32, %c0_i32_0 : i32, i32, i32
  }
}

</mosaic_0001>

<bundles_post_ra>
// kernel: dqnn_forward.1
= control target key start
LH: loop header
LB: loop body
LE: loop exit
PB: predicated region body
PF: predicated region fallthrough
CT: control target
= control target key end

     0   :  { %15 = vsyncpa [#allocation3], 0  ;;  %s5356_s0 = inlined_call_operand.vmem [shape: f32[2,8,64], index: 0, kind: input, shape index: {}]   ;;  %s5357_s1 = inlined_call_operand.vmem [shape: f32[2,8,64], index: 1, kind: input, shape index: {}]   ;;  %s5358_s2 = inlined_call_operand.vmem [shape: bf16[3,64,256], index: 2, kind: input, shape index: {}]   ;;  %s5359_s3 = inlined_call_operand.vmem [shape: f32[1,256], index: 3, kind: input, shape index: {}]   ;;  %s5360_s4 = inlined_call_operand.vmem [shape: bf16[3,256,256], index: 4, kind: input, shape index: {}]   ;;  %s5361_s5 = inlined_call_operand.vmem [shape: f32[1,256], index: 5, kind: input, shape index: {}]   ;;  %s5362_s6 = inlined_call_operand.vmem [shape: bf16[8,256,64], index: 6, kind: input, shape index: {}]   ;;  %s5363_s7 = inlined_call_operand.vmem [shape: f32[1,64], index: 7, kind: input, shape index: {}]   ;;  %s5364_s8 = inlined_call_operand.vmem [shape: bf16[64,128], index: 8, kind: input, shape index: {}]   ;;  %s5365_s9 = inlined_call_operand.vmem [shape: f32[1,128], index: 9, kind: input, shape index: {}]   ;;  %s5366_s10 = inlined_call_operand.hbm [shape: f32[2,1,128], index: 10, kind: output, shape index: {}]  }
   0x1   :  { %17 = vsyncpa [#allocation3 + $0x1], 0  ;;  %s4381_s13 = smov 0   ;;  %s4383_s14 = smov 0  }
   0x2   :  { %s4385_s15 = smov 0   ;;  %s4387_s16 = smov 0  }
   0x3 LB: > { %5368 = sst [smem:[#allocation5_spill]] %s4316_s15  ;;  %s4402_s17 = sadd.s32 4294967295, %s4320_s16   ;;  %s4320_s16 = sphi %s4387_s16, %s5378_s16   ;;  %s4316_s15 = sphi %s4385_s15, %s5375_s15   ;;  %s4312_s14 = sphi %s4383_s14, %s5377_s14   ;;  %s4308_s13 = sphi %s4381_s13, %s5376_s13  }
   0x4   : > { %s3129_s18 = sadd.s32 4294967294, %s4320_s16   ;;  %s4406_s19 = sadd.s32 1, %s4320_s16  }
   0x5   : > { %s250_s20 = sadd.s32 1, %s4316_s15  ;;  %s247_s21 = ssub.s32 %s4320_s16, %s4406_s19 }
   0x6   : > { %p260_p0 = scmp.ne.s32.totalorder %s4316_s15, %s4312_s14  ;;  %p248_p1 = scmp.eq.s32.totalorder %s247_s21, 0 }
   0x7   : > { %p261_p2 = scmp.eq.s32.totalorder %s4402_s17, 1  ;;  %p266_p3 = scmp.ne.s32.totalorder %s4312_s14, %s4308_s13 }
   0x8   : > { %p267_p4 = scmp.eq.s32.totalorder %s3129_s18, 1  ;;  %p3132_p7 = scmp.ge.s32.totalorder %s4320_s16, 1 }
   0x9   : > { %s4417_s22 = scalar_select %p248_p1, %s4316_s15, %s250_s20  }
   0xa   : > { %p4419_p5 = por %p261_p2, %p260_p0  ;;  %p4423_p6 = por %p267_p4, %p266_p3 }
   0xb   : > { %5369 = sst [smem:[#allocation6_spill]] %s4417_s22  ;;  %p323_p8 = scmp.lt.s32.totalorder %s4320_s16, 3 }
   0xd   : > { %p324_p9 = pnand %p3132_p7, %p323_p8 }
   0xe   : > { %v3946_v0 = vld [vmem:[%s5358_s2 + $0x44] ss:$8 sps:$4 sm:$0xff] (!%p324_p9)   ;;  %p363_p10 = scmp.lt.s32.totalorder (!%p324_p9), %s4402_s17, 1  ;;  %v4322_v2 = vmov (!%p324_p9), 0   ;;  %v3950_v3 = vld [vmem:[%s5358_s2 + $0x40] ss:$8 sps:$4 sm:$0xff] (!%p324_p9)  }
   0xf   : > { %327 = sbr.rel (%p324_p9) target bundleno = 1137 (0x471), region = 60  ;;  %v4436_v1 = vld [vmem:[%s5358_s2 + $0x4] ss:$8 sps:$4 sm:$0xff] (!%p324_p9)   ;;  %475 = vmatprep.mubr.bf16.mxu0 (!%p324_p9), %v4322_v2  ;;  %559 = vmatprep.mubr.bf16.mxu1 (!%p324_p9), %v4322_v2  ;;  %v4446_v4 = vld [vmem:[%s5358_s2] ss:$8 sps:$4 sm:$0xff] (!%p324_p9)   ;;  %vm377_vm0 = vcmask (!%p324_p9), 1040384  }
  0x10   : > { %443 = vmatprep.subr.bf16.mxu0 (!%p324_p9), %v3946_v0  ;;  %527 = vmatprep.subr.bf16.mxu1 (!%p324_p9), %v4436_v1  ;;  %v3952_v5 = vld [vmem:[%s5358_s2 + $0x54] ss:$8 sps:$4 sm:$0xff] (!%p324_p9)   ;;  %v3956_v7 = vld [vmem:[%s5358_s2 + $0x50] ss:$8 sps:$4 sm:$0xff] (!%p324_p9)   ;;  %v3958_v9 = vld [vmem:[%s5358_s2 + $0x64] ss:$8 sps:$4 sm:$0xff] (!%p324_p9)  }
  0x11   : > { %444 = vmatpush1.bf16.msra.mxu0 (!%p324_p9), %v3950_v3  ;;  %528 = vmatpush1.bf16.msra.mxu1 (!%p324_p9), %v4446_v4  ;;  %v4457_v6 = vld [vmem:[%s5358_s2 + $0x14] ss:$8 sps:$4 sm:$0xff] (!%p324_p9)   ;;  %v4465_v8 = vld [vmem:[%s5358_s2 + $0x10] ss:$8 sps:$4 sm:$0xff] (!%p324_p9)   ;;  %v4474_v10 = vld [vmem:[%s5358_s2 + $0x24] ss:$8 sps:$4 sm:$0xff] (!%p324_p9)  }
  0x12   : > { %445 = vmatprep.subr.bf16.mxu0 (!%p324_p9), %v3952_v5  ;;  %529 = vmatprep.subr.bf16.mxu1 (!%p324_p9), %v4457_v6  ;;  %v3962_v11 = vld [vmem:[%s5358_s2 + $0x60] ss:$8 sps:$4 sm:$0xff] (!%p324_p9)   ;;  %v3964_v13 = vld [vmem:[%s5358_s2 + $0x74] ss:$8 sps:$4 sm:$0xff] (!%p324_p9)   ;;  %v3968_v15 = vld [vmem:[%s5358_s2 + $0x70] ss:$8 sps:$4 sm:$0xff] (!%p324_p9)  }
  0x13   : > { %v4482_v12 = vld [vmem:[%s5358_s2 + $0x20] ss:$8 sps:$4 sm:$0xff] (!%p324_p9)   ;;  %v4495_v14 = vld [vmem:[%s5358_s2 + $0x34] ss:$8 sps:$4 sm:$0xff] (!%p324_p9)   ;;  %v4507_v17 = vld [vmem:[%s5358_s2 + $0x30] ss:$8 sps:$4 sm:$0xff] (!%p324_p9)  }
  0x14   : > { %v3972_v20 = vld [vmem:[%s5358_s2 + $0x84] ss:$8 sps:$4 sm:$0xff] (!%p324_p9)   ;;  %vm439_vm1 = vcmask (!%p324_p9), 523264   ;;  %v3970_v24 = vld [vmem:[%s5358_s2 + $0x80] ss:$8 sps:$4 sm:$0xff] (!%p324_p9)   ;;  %v4323_v36 = vmov (!%p324_p9), 0.0   ;;  %vm4793_vm2 = vmneg (!%p324_p9), %vm377_vm0 }
  0x15   : > { %446 = vmatpush1.bf16.msra.mxu0 (!%p324_p9), %v3956_v7  ;;  %530 = vmatpush1.bf16.msra.mxu1 (!%p324_p9), %v4465_v8  ;;  %v3975_v25 = vld [vmem:[%s5358_s2 + $0x94] ss:$8 sps:$4 sm:$0xff] (!%p324_p9)   ;;  %v3973_v27 = vld [vmem:[%s5358_s2 + $0x90] ss:$8 sps:$4 sm:$0xff] (!%p324_p9)   ;;  %v3978_v28 = vld [vmem:[%s5358_s2 + $0xa4] ss:$8 sps:$4 sm:$0xff] (!%p324_p9)  }
  0x16   : > { %s364_s18 = scalar_select %p363_p10, %s4402_s17, 1  ;;  %447 = vmatprep.subr.bf16.mxu0 %v3958_v9  ;;  %531 = vmatprep.subr.bf16.mxu1 %v4474_v10  ;;  %v3976_v30 = vld [vmem:[%s5358_s2 + $0xa0] ss:$8 sps:$4 sm:$0xff]   ;;  %v3981_v31 = vld [vmem:[%s5358_s2 + $0xb4] ss:$8 sps:$4 sm:$0xff]   ;;  %vm3279_vm3 = vmpackc.low %vm4793_vm2, %vm4793_vm2  ;;  %vm4324_vm4 = vmmov 0  }
  0x17   : > { %v3979_v34 = vld [vmem:[%s5358_s2 + $0xb0] ss:$8 sps:$4 sm:$0xff]   ;;  %v3984_v41 = vld [vmem:[%s5360_s4 + $0x104] ss:$8 sps:$4 sm:$0xff]   ;;  %v3982_v43 = vld [vmem:[%s5360_s4 + $0x100] ss:$8 sps:$4 sm:$0xff]  }
  0x18   : > { %s3133_s11 = sshll.u32 %s364_s18, 3  ;;  %v4002_v42 = vld [vmem:[%s5360_s4 + $0x4] ss:$8 sps:$4 sm:$0xff]   ;;  %v4000_v44 = vld [vmem:[%s5360_s4] ss:$8 sps:$4 sm:$0xff]   ;;  %s4325_s26 = smov [#allocation2]  }
  0x19   : > { %s370_s21 = scalar_lea.vmem %s5357_s1, %s3133_s11  ;;  %s366_s29 = scalar_lea.vmem %s5356_s0, %s3133_s11  ;;  %448 = vmatpush1.bf16.msra.mxu0 %v3962_v11  ;;  %532 = vmatpush1.bf16.msra.mxu1 %v4482_v12  ;;  %v3987_v46 = vld [vmem:[%s5360_s4 + $0x114] ss:$8 sps:$4 sm:$0xff]   ;;  %v3985_v48 = vld [vmem:[%s5360_s4 + $0x110] ss:$8 sps:$4 sm:$0xff]   ;;  %v3990_v50 = vld [vmem:[%s5360_s4 + $0x124] ss:$8 sps:$4 sm:$0xff]  }
  0x1a   : > { %v373_v16 = vld [vmem:[%s370_s21] sm:$0xff]  ;;  %449 = vmatprep.subr.bf16.mxu0 %v3964_v13  ;;  %533 = vmatprep.subr.bf16.mxu1 %v4495_v14  ;;  %v4008_v47 = vld [vmem:[%s5360_s4 + $0x14] ss:$8 sps:$4 sm:$0xff]   ;;  %v4006_v49 = vld [vmem:[%s5360_s4 + $0x10] ss:$8 sps:$4 sm:$0xff]   ;;  %s3708_s11 = sshll.u32 %s4402_s17, 4 }
  0x1b   : > { %v372_v18 = vld [vmem:[%s366_s29] sm:$0xff]  ;;  %v375_v19 = vrot.slane %v373_v16, 7  ;;  %v3993_v54 = vld [vmem:[%s5360_s4 + $0x134] ss:$8 sps:$4 sm:$0xff]   ;;  %v3991_v56 = vld [vmem:[%s5360_s4 + $0x130] ss:$8 sps:$4 sm:$0xff]   ;;  %s5314_s21 = scalar_lea.hbm %s5366_s10, %s3708_s11 }
  0x1c   : > { %v4514_v22 = vpack.c.bf16 %v372_v18, %v372_v18  ;;  %v753_v37 = vpack.c.bf16 %v4323_v36, %v372_v18  ;;  %v4014_v51 = vld [vmem:[%s5360_s4 + $0x24] ss:$8 sps:$4 sm:$0xff]   ;;  %v3988_v52 = vld [vmem:[%s5360_s4 + $0x120] ss:$8 sps:$4 sm:$0xff]   ;;  %v4020_v55 = vld [vmem:[%s5360_s4 + $0x34] ss:$8 sps:$4 sm:$0xff]  }
  0x1d   : > { %v378_v21 = vsel %vm377_vm0, 0.0, %v375_v19  ;;  %450 = vmatpush1.bf16.msra.mxu0 %v3968_v15  ;;  %534 = vmatpush1.bf16.msra.mxu1 %v4507_v17  ;;  %v4012_v53 = vld [vmem:[%s5360_s4 + $0x20] ss:$8 sps:$4 sm:$0xff]   ;;  %v4018_v57 = vld [vmem:[%s5360_s4 + $0x30] ss:$8 sps:$4 sm:$0xff]   ;;  %s361_s29 = sand.u32 1, %s4312_s14  }
  0x1e   : > { %v388_v23 = vpack.c.bf16 %v378_v21, %v378_v21  ;;  %628 = vmatprep.subr.bf16.mxu0 %v3972_v20  ;;  %671 = vmatprep.subr.bf16.mxu1 %v3946_v0  ;;  %v577_v26 = vpack.c.bf16 %v375_v19, %v378_v21  ;;  %v757_v38 = vshll.u32 %v753_v37, 16  ;;  %v755_v39 = vshrl.u32 %v753_v37, 16  ;;  %v3996_v58 = vld [vmem:[%s5360_s4 + $0x144] ss:$8 sps:$4 sm:$0xff]   ;;  %v3994_v60 = vld [vmem:[%s5360_s4 + $0x140] ss:$8 sps:$4 sm:$0xff]  }
  0x1f   : > { %v4026_v59 = vld [vmem:[%s5360_s4 + $0x44] ss:$8 sps:$4 sm:$0xff]   ;;  %v4024_v61 = vld [vmem:[%s5360_s4 + $0x40] ss:$8 sps:$4 sm:$0xff]   ;;  %v3999_v62 = vld [vmem:[%s5360_s4 + $0x154] ss:$8 sps:$4 sm:$0xff]  }
  0x20   : > { %3151 = vmatmul.mubr.msk.bf16.vlgmr.msra.gmra.mrb[0].mxu0 %vm439_vm1, %v4514_v22  ;;  %3160 = vmatmul.mubr.msk.bf16.vlgmr.msra.gmra.mrb[0].mxu1 %vm439_vm1, %v388_v23  ;;  %v581_v29 = vshll.u32 %v577_v26, 16  ;;  %v579_v32 = vshrl.u32 %v577_v26, 16  ;;  %v759_v40 = vrot.slane %v757_v38, 1  ;;  %v3997_v63 = vld [vmem:[%s5360_s4 + $0x150] ss:$8 sps:$4 sm:$0xff]   ;;  %s362_s12 = scalar_lea.vmem [#allocation2], %s361_s29 }
  0x21   : > { %629 = vmatpush1.bf16.msra.mxu0 %v3970_v24  ;;  %672 = vmatpush1.bf16.msra.mxu1 %v3950_v3  ;;  %v4005_v0 = vld [vmem:[%s5360_s4 + $0x164] ss:$8 sps:$4 sm:$0xff]   ;;  %v4009_v3 = vld [vmem:[%s5360_s4 + $0x170] ss:$8 sps:$4 sm:$0xff]   ;;  %v4039_v18 = vld [vmem:[%s5360_s4 + $0x1c0] ss:$8 sps:$4 sm:$0xff]  }
  0x22   : > { %630 = vmatprep.subr.bf16.mxu0 %v3975_v25  ;;  %673 = vmatprep.subr.bf16.mxu1 %v3952_v5  ;;  %v583_v33 = vrot.slane %v581_v29, 1  ;;  %v760_v45 = vor.u32 %v759_v40, %v755_v39  ;;  %v4015_v5 = vld [vmem:[%s5360_s4 + $0x180] ss:$8 sps:$4 sm:$0xff]   ;;  %v4041_v16 = vld [vmem:[%s5360_s4 + $0x1c4] ss:$8 sps:$4 sm:$0xff]   ;;  %s3062_s15 = sshll.u32 %s362_s12, 4  ;;  %s5316_s15 = int_to_ptr.vmem [resolvable:$true] %s3062_s15 }
  0x23   : > { %660 = vmatprep.mubr.bf16.mxu0 %v4322_v2  ;;  %703 = vmatprep.mubr.bf16.mxu1 %v4322_v2  ;;  %v4042_v19 = vld [vmem:[%s5360_s4 + $0x70] ss:$8 sps:$4 sm:$0xff]   ;;  %v4050_v21 = vld [vmem:[%s5360_s4 + $0x84] ss:$8 sps:$4 sm:$0xff]   ;;  %v4048_v23 = vld [vmem:[%s5360_s4 + $0x80] ss:$8 sps:$4 sm:$0xff]  }
  0x24   : > { %v584_v35 = vor.u32 %v583_v33, %v579_v32  ;;  %v4056_v26 = vld [vmem:[%s5360_s4 + $0x94] ss:$8 sps:$4 sm:$0xff]   ;;  %v4057_v29 = vld [vmem:[%s5360_s4 + $0x1f0] ss:$8 sps:$4 sm:$0xff]   ;;  %v4065_v32 = vld [vmem:[%s5360_s4 + $0x204] ss:$8 sps:$4 sm:$0xff]  }
  0x25   : > { %631 = vmatpush1.bf16.msra.mxu0 %v3973_v27  ;;  %674 = vmatpush1.bf16.msra.mxu1 %v3956_v7  ;;  %v4021_v7 = vld [vmem:[%s5360_s4 + $0x190] ss:$8 sps:$4 sm:$0xff]   ;;  %v4068_v33 = vld [vmem:[%s5360_s4 + $0xb4] ss:$8 sps:$4 sm:$0xff]   ;;  %v4074_v37 = vld [vmem:[%s5360_s4 + $0xc4] ss:$8 sps:$4 sm:$0xff]  }
  0x26   : > { %632 = vmatprep.subr.bf16.mxu0 %v3978_v28  ;;  %675 = vmatprep.subr.bf16.mxu1 %v3958_v9  ;;  %v4027_v9 = vld [vmem:[%s5360_s4 + $0x1a0] ss:$8 sps:$4 sm:$0xff]   ;;  %v4080_v38 = vld [vmem:[%s5360_s4 + $0xd4] ss:$8 sps:$4 sm:$0xff]   ;;  %v4078_v39 = vld [vmem:[%s5360_s4 + $0xd0] ss:$8 sps:$4 sm:$0xff]  }
  0x27   : > { %v4086_v40 = vld [vmem:[%s5360_s4 + $0xe4] ss:$8 sps:$4 sm:$0xff]   ;;  %s3050_s25 = scalar_lea.sflag [#allocation3], %s361_s29  ;;  %s4258_s17 = scalar_lea.vmem %s5316_s15, 16 }
  0x28   : > { %p4259_p11 = scmp.ne.s32.totalorder %s5316_s15, %s4258_s17  ;;  %s4262_s27 = sshll.u32 %s4325_s26, 4  ;;  %s4263_s27 = int_to_ptr.vmem [resolvable:$false] %s4262_s27 }
  0x29   : > { %633 = vmatpush1.bf16.msra.mxu0 %v3976_v30  ;;  %676 = vmatpush1.bf16.msra.mxu1 %v3962_v11  ;;  %v4030_v11 = vld [vmem:[%s5360_s4 + $0x50] ss:$8 sps:$4 sm:$0xff]   ;;  %s4264_s28 = scalar_lea.vmem %s4263_s27, 32  ;;  %p4265_p0 = scmp.lt.s32.totalorder %s5316_s15, %s4263_s27 }
  0x2a   : > { %634 = vmatprep.subr.bf16.mxu0 %v3981_v31  ;;  %677 = vmatprep.subr.bf16.mxu1 %v3964_v13  ;;  %v4035_v13 = vld [vmem:[%s5360_s4 + $0x1b4] ss:$8 sps:$4 sm:$0xff]   ;;  %p4260_p12 = pnand %p4259_p11, %p4419_p5  ;;  %p4266_p1 = scmp.lt.s32.totalorder %s4264_s28, %s4258_s17 }
  0x2c   : > { %p4261_p13 = pneg %p4260_p12  ;;  %p4267_p2 = por %p4266_p1, %p4265_p0 }
  0x2d   : > { %635 = vmatpush1.bf16.msra.mxu0 %v3979_v34  ;;  %678 = vmatpush1.bf16.msra.mxu1 %v3968_v15  ;;  %v4038_v15 = vld [vmem:[%s5360_s4 + $0x64] ss:$8 sps:$4 sm:$0xff]  }
  0x2e   : > { %712 = vmatprep.subr.bf16.mxu0 %v4436_v1  ;;  %764 = vmatprep.subr.bf16.mxu1 %v3972_v20  ;;  %v4003_v1 = vld [vmem:[%s5360_s4 + $0x160] ss:$8 sps:$4 sm:$0xff]   ;;  %v4047_v20 = vld [vmem:[%s5360_s4 + $0x1d4] ss:$8 sps:$4 sm:$0xff]   ;;  %p4268_p3 = pnand %p4267_p2, %p4261_p13 }
  0x30   : > { %3177 = vmatmul.mubr.msk.bf16.vlgmr.msra.gmra.mrb[4].mxu0 %vm439_vm1, %v584_v35  ;;  %3178 = vmatmul.mubr.msk.bf16.vlgmr.msra.gmra.mrb[4].mxu1 %vm439_vm1, %v584_v35  ;;  %v4072_v35 = vld [vmem:[%s5360_s4 + $0xc0] ss:$8 sps:$4 sm:$0xff]  }
  0x31   : > { %713 = vmatpush1.bf16.msra.mxu0 %v4446_v4  ;;  %765 = vmatpush1.bf16.msra.mxu1 %v3970_v24  ;;  %v4017_v4 = vld [vmem:[%s5360_s4 + $0x184] ss:$8 sps:$4 sm:$0xff]  }
  0x32   : > { %714 = vmatprep.subr.bf16.mxu0 %v4457_v6  ;;  %766 = vmatprep.subr.bf16.mxu1 %v3975_v25  ;;  %v4023_v6 = vld [vmem:[%s5360_s4 + $0x194] ss:$8 sps:$4 sm:$0xff]   ;;  %v4053_v24 = vld [vmem:[%s5360_s4 + $0x1e4] ss:$8 sps:$4 sm:$0xff]   ;;  %v4051_v25 = vld [vmem:[%s5360_s4 + $0x1e0] ss:$8 sps:$4 sm:$0xff]  }
  0x33   : > { %744 = vmatprep.mubr.bf16.mxu0 %v4322_v2  ;;  %796 = vmatprep.mubr.bf16.mxu1 %v4322_v2  ;;  %v4011_v2 = vld [vmem:[%s5360_s4 + $0x174] ss:$8 sps:$4 sm:$0xff]  }
  0x35   : > { %715 = vmatpush1.bf16.msra.mxu0 %v4465_v8  ;;  %767 = vmatpush1.bf16.msra.mxu1 %v3973_v27  ;;  %v4029_v8 = vld [vmem:[%s5360_s4 + $0x1a4] ss:$8 sps:$4 sm:$0xff]   ;;  %v4054_v27 = vld [vmem:[%s5360_s4 + $0x90] ss:$8 sps:$4 sm:$0xff]  }
  0x36   : > { %716 = vmatprep.subr.bf16.mxu0 %v4474_v10  ;;  %768 = vmatprep.subr.bf16.mxu1 %v3978_v28  ;;  %v4032_v10 = vld [vmem:[%s5360_s4 + $0x54] ss:$8 sps:$4 sm:$0xff]  }
  0x37   : > { %v4059_v28 = vld [vmem:[%s5360_s4 + $0x1f4] ss:$8 sps:$4 sm:$0xff]  }
  0x39   : > { %717 = vmatpush1.bf16.msra.mxu0 %v4482_v12  ;;  %769 = vmatpush1.bf16.msra.mxu1 %v3976_v30  ;;  %v4033_v12 = vld [vmem:[%s5360_s4 + $0x1b0] ss:$8 sps:$4 sm:$0xff]   ;;  %v4062_v30 = vld [vmem:[%s5360_s4 + $0xa4] ss:$8 sps:$4 sm:$0xff]  }
  0x3a   : > { %718 = vmatprep.subr.bf16.mxu0 %v4495_v14  ;;  %770 = vmatprep.subr.bf16.mxu1 %v3981_v31  ;;  %v4036_v14 = vld [vmem:[%s5360_s4 + $0x60] ss:$8 sps:$4 sm:$0xff]  }
  0x3b   : > { %v4060_v31 = vld [vmem:[%s5360_s4 + $0xa0] ss:$8 sps:$4 sm:$0xff]  }
  0x3d   : > { %719 = vmatpush1.bf16.msra.mxu0 %v4507_v17  ;;  %771 = vmatpush1.bf16.msra.mxu1 %v3979_v34  ;;  %v4044_v17 = vld [vmem:[%s5360_s4 + $0x74] ss:$8 sps:$4 sm:$0xff]   ;;  %v4066_v34 = vld [vmem:[%s5360_s4 + $0xb0] ss:$8 sps:$4 sm:$0xff]  }
  0x3e   : > { %1063 = vmatprep.subr.bf16.mxu0 %v3984_v41  ;;  %1264 = vmatprep.subr.bf16.mxu1 %v4002_v42  ;;  %v4084_v41 = vld [vmem:[%s5360_s4 + $0xe0] ss:$8 sps:$4 sm:$0xff]   ;;  %v4092_v42 = vld [vmem:[%s5360_s4 + $0xf4] ss:$8 sps:$4 sm:$0xff]  }
  0x40   : > { %3179 = vmatmul.mubr.msk.bf16.vlgmr.msra.gmra.mrb[8].mxu0 %vm439_vm1, %v4514_v22  ;;  %3180 = vmatmul.mubr.msk.bf16.vlgmr.msra.gmra.mrb[8].mxu1 %vm439_vm1, %v760_v45  ;;  %v4045_v22 = vld [vmem:[%s5360_s4 + $0x1d0] ss:$8 sps:$4 sm:$0xff]  }
  0x41   : > { %1064 = vmatpush1.bf16.msra.mxu0 %v3982_v43  ;;  %1265 = vmatpush1.bf16.msra.mxu1 %v4000_v44  ;;  %v4090_v43 = vld [vmem:[%s5360_s4 + $0xf0] ss:$8 sps:$4 sm:$0xff]  }
  0x42   : > { %1065 = vmatprep.subr.bf16.mxu0 %v3987_v46  ;;  %1266 = vmatprep.subr.bf16.mxu1 %v4008_v47 }
  0x45   : > { %1066 = vmatpush1.bf16.msra.mxu0 %v3985_v48  ;;  %1267 = vmatpush1.bf16.msra.mxu1 %v4006_v49 }
  0x46   : > { %1067 = vmatprep.subr.bf16.mxu0 %v3990_v50  ;;  %1268 = vmatprep.subr.bf16.mxu1 %v4014_v51 }
  0x49   : > { %1068 = vmatpush1.bf16.msra.mxu0 %v3988_v52  ;;  %1269 = vmatpush1.bf16.msra.mxu1 %v4012_v53 }
  0x4a   : > { %1069 = vmatprep.subr.bf16.mxu0 %v3993_v54  ;;  %1270 = vmatprep.subr.bf16.mxu1 %v4020_v55  ;;  %v808_v54 = vlaneseq }
  0x4c   : > { %v4754_v55 = vshrl.u32 %v808_v54, 7 }
  0x4d   : > { %1070 = vmatpush1.bf16.msra.mxu0 %v3991_v56  ;;  %1271 = vmatpush1.bf16.msra.mxu1 %v4018_v57  ;;  %v379_v57 = vld [vmem:[%s5359_s3] sm:$0x3] }
  0x4e   : > { %1071 = vmatprep.subr.bf16.mxu0 %v3996_v58  ;;  %1272 = vmatprep.subr.bf16.mxu1 %v4026_v59  ;;  %v810_v56 = vsub.s32 0, %v4754_v55  ;;  %v814_v58 = vsub.s32 1, %v4754_v55  ;;  %v4160_v55 = vld [vmem:[%s5362_s6] sm:$0xff]  }
  0x50   : > { %v811_v59 = vrot.slane %v379_v57, %v810_v56 }
  0x51   : > { %1072 = vmatpush1.bf16.msra.mxu0 %v3994_v60  ;;  %1273 = vmatpush1.bf16.msra.mxu1 %v4024_v61  ;;  %v815_v61 = vrot.slane %v379_v57, %v814_v58  ;;  %v4099_v57 = vld [vmem:[%s5360_s4 + $0x270] ss:$8 sps:$4 sm:$0xff]  }
  0x52   : > { %1073 = vmatprep.subr.bf16.mxu0 %v3999_v62  ;;  %1274 = vmatprep.subr.bf16.mxu1 %v4032_v10 }
  0x55   : > { %1074 = vmatpush1.bf16.msra.mxu0 %v3997_v63  ;;  %1275 = vmatpush1.bf16.msra.mxu1 %v4030_v11 }
  0x56   : > { %1075 = vmatprep.subr.bf16.mxu0 %v4005_v0  ;;  %1276 = vmatprep.subr.bf16.mxu1 %v4038_v15  ;;  %v4069_v15 = vld [vmem:[%s5360_s4 + $0x210] ss:$8 sps:$4 sm:$0xff]  }
  0x59   : > { %1076 = vmatpush1.bf16.msra.mxu0 %v4003_v1  ;;  %1277 = vmatpush1.bf16.msra.mxu1 %v4036_v14  ;;  %v4071_v14 = vld [vmem:[%s5360_s4 + $0x214] ss:$8 sps:$4 sm:$0xff]  }
  0x5a   : > { %1077 = vmatprep.subr.bf16.mxu0 %v4011_v2  ;;  %1278 = vmatprep.subr.bf16.mxu1 %v4044_v17 }
  0x5d   : > { %1078 = vmatpush1.bf16.msra.mxu0 %v4009_v3  ;;  %1279 = vmatpush1.bf16.msra.mxu1 %v4042_v19  ;;  %v4075_v19 = vld [vmem:[%s5360_s4 + $0x220] ss:$8 sps:$4 sm:$0xff]  }
  0x5e   : > { %1079 = vmatprep.subr.bf16.mxu0 %v4017_v4  ;;  %1280 = vmatprep.subr.bf16.mxu1 %v4050_v21 }
  0x61   : > { %1080 = vmatpush1.bf16.msra.mxu0 %v4015_v5  ;;  %1281 = vmatpush1.bf16.msra.mxu1 %v4048_v23  ;;  %v4083_v23 = vld [vmem:[%s5360_s4 + $0x234] ss:$8 sps:$4 sm:$0xff]  }
  0x62   : > { %1081 = vmatprep.subr.bf16.mxu0 %v4023_v6  ;;  %1282 = vmatprep.subr.bf16.mxu1 %v4056_v26 }
  0x65   : > { %1082 = vmatpush1.bf16.msra.mxu0 %v4021_v7  ;;  %1283 = vmatpush1.bf16.msra.mxu1 %v4054_v27 }
  0x66   : > { %1083 = vmatprep.subr.bf16.mxu0 %v4029_v8  ;;  %1284 = vmatprep.subr.bf16.mxu1 %v4062_v30 }
  0x69   : > { %1084 = vmatpush1.bf16.msra.mxu0 %v4027_v9  ;;  %1285 = vmatpush1.bf16.msra.mxu1 %v4060_v31  ;;  %v4081_v31 = vld [vmem:[%s5360_s4 + $0x230] ss:$8 sps:$4 sm:$0xff]  }
  0x6a   : > { %1085 = vmatprep.subr.bf16.mxu0 %v4035_v13  ;;  %1286 = vmatprep.subr.bf16.mxu1 %v4068_v33  ;;  %v4089_v33 = vld [vmem:[%s5360_s4 + $0x244] ss:$8 sps:$4 sm:$0xff]  }
  0x6d   : > { %1086 = vmatpush1.bf16.msra.mxu0 %v4033_v12  ;;  %1287 = vmatpush1.bf16.msra.mxu1 %v4066_v34  ;;  %v4063_v12 = vld [vmem:[%s5360_s4 + $0x200] ss:$8 sps:$4 sm:$0xff]  }
  0x6e   : > { %1087 = vmatprep.subr.bf16.mxu0 %v4041_v16  ;;  %1288 = vmatprep.subr.bf16.mxu1 %v4074_v37  ;;  %v4077_v16 = vld [vmem:[%s5360_s4 + $0x224] ss:$8 sps:$4 sm:$0xff]  }
  0x71   : > { %1088 = vmatpush1.bf16.msra.mxu0 %v4039_v18  ;;  %1289 = vmatpush1.bf16.msra.mxu1 %v4072_v35 }
  0x72   : > { %1089 = vmatprep.subr.bf16.mxu0 %v4047_v20  ;;  %1290 = vmatprep.subr.bf16.mxu1 %v4080_v38  ;;  %v4087_v38 = vld [vmem:[%s5360_s4 + $0x240] ss:$8 sps:$4 sm:$0xff]  }
  0x75   : > { %1090 = vmatpush1.bf16.msra.mxu0 %v4045_v22  ;;  %1291 = vmatpush1.bf16.msra.mxu1 %v4078_v39  ;;  %v4147_v39 = vld [vmem:[%s5362_s6 + $0x168] sm:$0xff]  }
  0x76   : > { %1091 = vmatprep.subr.bf16.mxu0 %v4053_v24  ;;  %1292 = vmatprep.subr.bf16.mxu1 %v4086_v40 }
  0x79   : > { %1092 = vmatpush1.bf16.msra.mxu0 %v4051_v25  ;;  %1293 = vmatpush1.bf16.msra.mxu1 %v4084_v41  ;;  %v4095_v41 = vld [vmem:[%s5360_s4 + $0x254] ss:$8 sps:$4 sm:$0xff]  }
  0x7a   : > { %1093 = vmatprep.subr.bf16.mxu0 %v4059_v28  ;;  %1294 = vmatprep.subr.bf16.mxu1 %v4092_v42 }
  0x7d   : > { %1094 = vmatpush1.bf16.msra.mxu0 %v4057_v29  ;;  %1295 = vmatpush1.bf16.msra.mxu1 %v4090_v43 }
  0x7e   : > { %1516 = vmatprep.subr.bf16.mxu0 %v4065_v32 }
  0xf3   : > { %v477_v44 = vpop.f32.mrb[0].mxu0  ;;  %v561_v45 = vpop.f32.mrb[0].mxu1 }
  0xf4   : > { %v562_v46 = vadd.f32 %v561_v45, %v477_v44  ;;  %v479_v47 = vpop.f32.mrb[1].mxu0  ;;  %v563_v48 = vpop.f32.mrb[1].mxu1 }
  0xf5   : > { %v564_v49 = vadd.f32 %v563_v48, %v479_v47  ;;  %v481_v50 = vpop.f32.mrb[2].mxu0  ;;  %v565_v51 = vpop.f32.mrb[2].mxu1  ;;  %v4098_v47 = vld [vmem:[%s5360_s4 + $0x264] ss:$8 sps:$4 sm:$0xff]  }
  0xf6   : > { %v482_v52 = vpop.f32.mrb[3].mxu0  ;;  %v566_v53 = vpop.f32.mrb[3].mxu1  ;;  %v4096_v51 = vld [vmem:[%s5360_s4 + $0x260] ss:$8 sps:$4 sm:$0xff]  }
  0xf7   : > { %v4101_v52 = vld [vmem:[%s5360_s4 + $0x274] ss:$8 sps:$4 sm:$0xff]  }
 0x103   : > { %v662_v60 = vpop.f32.mrb[4].mxu0  ;;  %v705_v62 = vpop.f32.mrb[4].mxu1 }
 0x104   : > { %v669_v63 = vadd.f32 %v662_v60, %v562_v46  ;;  %v664_v0 = vpop.f32.mrb[5].mxu0  ;;  %v707_v1 = vpop.f32.mrb[5].mxu1  ;;  %v4093_v46 = vld [vmem:[%s5360_s4 + $0x250] ss:$8 sps:$4 sm:$0xff]   ;;  %v4102_v60 = vld [vmem:[%s5360_s4 + $0x280] ss:$8 sps:$4 sm:$0xff]  }
 0x105   : > { %v670_v2 = vadd.f32 %v664_v0, %v564_v49  ;;  %v666_v3 = vpop.f32.mrb[6].mxu0  ;;  %v709_v4 = vpop.f32.mrb[6].mxu1  ;;  %v4108_v0 = vld [vmem:[%s5360_s4 + $0x2a0] ss:$8 sps:$4 sm:$0xff]  }
 0x106   : > { %v818_v5 = vadd.f32 %v811_v59, %v669_v63  ;;  %v667_v6 = vpop.f32.mrb[7].mxu0  ;;  %v710_v7 = vpop.f32.mrb[7].mxu1  ;;  %v4110_v63 = vld [vmem:[%s5360_s4 + $0x2a4] ss:$8 sps:$4 sm:$0xff]   ;;  %v4114_v4 = vld [vmem:[%s5360_s4 + $0x2c0] ss:$8 sps:$4 sm:$0xff]  }
 0x107   : > { %v819_v8 = vadd.f32 %v815_v61, %v670_v2  ;;  %v4111_v2 = vld [vmem:[%s5360_s4 + $0x2b0] ss:$8 sps:$4 sm:$0xff]   ;;  %v4116_v3 = vld [vmem:[%s5360_s4 + $0x2c4] ss:$8 sps:$4 sm:$0xff]  }
 0x108   : > { %v820_v9 = vmax.f32 %v818_v5, 0.0  ;;  %v4119_v5 = vld [vmem:[%s5360_s4 + $0x2d4] ss:$8 sps:$4 sm:$0xff]   ;;  %v4117_v7 = vld [vmem:[%s5360_s4 + $0x2d0] ss:$8 sps:$4 sm:$0xff]  }
 0x109   : > { %v821_v10 = vmax.f32 %v819_v8, 0.0 }
 0x10a   : > { %v901_v13 = vpack.c.bf16 %v820_v9, %v820_v9  ;;  %v4122_v9 = vld [vmem:[%s5360_s4 + $0x2e4] ss:$8 sps:$4 sm:$0xff]  }
 0x10b   : > { %v902_v11 = vpack.c.bf16 %v821_v10, %v821_v10  ;;  %v4120_v10 = vld [vmem:[%s5360_s4 + $0x2e0] ss:$8 sps:$4 sm:$0xff]  }
 0x10d   : > { %1095 = vmatprep.mubr.bf16.mxu0 %v902_v11  ;;  %v4125_v11 = vld [vmem:[%s5360_s4 + $0x2f4] ss:$8 sps:$4 sm:$0xff]  }
 0x10e   : > { %1096 = vmatmul.mubr.bf16.vlgmr.msra.gmra.mrb[12].mxu0 %v901_v13  ;;  %v4123_v13 = vld [vmem:[%s5360_s4 + $0x2f0] ss:$8 sps:$4 sm:$0xff]  }
 0x10f   : > { %1517 = vmatpush1.bf16.msra.mxu0 %v4063_v12 }
 0x110   : > { %1518 = vmatprep.subr.bf16.mxu0 %v4071_v14 }
 0x113   : > { %1519 = vmatpush1.bf16.msra.mxu0 %v4069_v15  ;;  %v746_v17 = vpop.f32.mrb[8].mxu0  ;;  %v798_v18 = vpop.f32.mrb[8].mxu1 }
 0x114   : > { %v747_v20 = vadd.f32 %v746_v17, %v705_v62  ;;  %v748_v21 = vpop.f32.mrb[9].mxu0  ;;  %1520 = vmatprep.subr.bf16.mxu0 %v4077_v16  ;;  %v800_v22 = vpop.f32.mrb[9].mxu1  ;;  %v4105_v62 = vld [vmem:[%s5360_s4 + $0x290] ss:$8 sps:$4 sm:$0xff]   ;;  %v4126_v17 = vld [vmem:[%s5362_s6 + $0xc0] sm:$0xff]  }
 0x115   : > { %v749_v24 = vadd.f32 %v748_v21, %v707_v1  ;;  %v750_v25 = vpop.f32.mrb[10].mxu0  ;;  %v802_v26 = vpop.f32.mrb[10].mxu1  ;;  %v4113_v1 = vld [vmem:[%s5360_s4 + $0x2b4] ss:$8 sps:$4 sm:$0xff]   ;;  %v4130_v21 = vld [vmem:[%s5362_s6 + $0xc8] sm:$0xff]   ;;  %3711 = vmatprep.subr.bf16.mxu1 %v4126_v17 }
 0x116   : > { %v805_v27 = vadd.f32 %v798_v18, %v747_v20  ;;  %v751_v28 = vpop.f32.mrb[11].mxu0  ;;  %v803_v29 = vpop.f32.mrb[11].mxu1  ;;  %v4127_v18 = vld [vmem:[%s5362_s6 + $0x140] sm:$0xff]   ;;  %v4134_v25 = vld [vmem:[%s5362_s6 + $0xd0] sm:$0xff]  }
 0x117   : > { %v806_v30 = vadd.f32 %v800_v22, %v749_v24  ;;  %1521 = vmatpush1.bf16.msra.mxu0 %v4075_v19  ;;  %v4128_v19 = vld [vmem:[%s5362_s6 + $0x80] sm:$0xff]   ;;  %v4131_v22 = vld [vmem:[%s5362_s6 + $0x148] sm:$0xff]   ;;  %v4135_v26 = vld [vmem:[%s5362_s6 + $0x150] sm:$0xff]  }
 0x118   : > { %v822_v32 = vadd.f32 %v811_v59, %v805_v27  ;;  %1522 = vmatprep.subr.bf16.mxu0 %v4083_v23  ;;  %v4104_v59 = vld [vmem:[%s5360_s4 + $0x284] ss:$8 sps:$4 sm:$0xff]   ;;  %v4136_v27 = vld [vmem:[%s5362_s6 + $0x90] sm:$0xff]   ;;  %v4138_v29 = vld [vmem:[%s5362_s6 + $0xd8] sm:$0xff]  }
 0x119   : > { %v823_v34 = vadd.f32 %v815_v61, %v806_v30  ;;  %v4107_v61 = vld [vmem:[%s5360_s4 + $0x294] ss:$8 sps:$4 sm:$0xff]   ;;  %v4129_v20 = vld [vmem:[%s5362_s6 + $0x100] sm:$0xff]   ;;  %v4132_v23 = vld [vmem:[%s5362_s6 + $0x88] sm:$0xff]  }
 0x11a   : > { %v824_v35 = vmax.f32 %v822_v32, 0.0  ;;  %v4133_v24 = vld [vmem:[%s5362_s6 + $0x108] sm:$0xff]   ;;  %v4137_v28 = vld [vmem:[%s5362_s6 + $0x110] sm:$0xff]   ;;  %v4139_v30 = vld [vmem:[%s5362_s6 + $0x158] sm:$0xff]  }
 0x11b   : > { %v825_v37 = vmax.f32 %v823_v34, 0.0  ;;  %1523 = vmatpush1.bf16.msra.mxu0 %v4081_v31  ;;  %v4140_v31 = vld [vmem:[%s5362_s6 + $0x98] sm:$0xff]   ;;  %v4143_v34 = vld [vmem:[%s5362_s6 + $0x160] sm:$0xff]  }
 0x11c   : > { %v828_v40 = vrot.slane %v824_v35, 7  ;;  %1524 = vmatprep.subr.bf16.mxu0 %v4089_v33  ;;  %v4141_v32 = vld [vmem:[%s5362_s6 + $0x118] sm:$0xff]   ;;  %v4142_v33 = vld [vmem:[%s5362_s6 + $0xe0] sm:$0xff]  }
 0x11d   : > { %v829_v42 = vrot.slane %v825_v37, 7  ;;  %v4144_v35 = vld [vmem:[%s5362_s6 + $0xa0] sm:$0xff]  }
 0x11e   : > { %v3285_v43 = vpack.c.bf16 %v828_v40, %v828_v40  ;;  %v832_v6 = vsel %vm377_vm0, 0.0, %v828_v40  ;;  %v4145_v37 = vld [vmem:[%s5362_s6 + $0x120] sm:$0xff]  }
 0x11f   : > { %v833_v44 = vsel %vm377_vm0, 0.0, %v829_v42  ;;  %1525 = vmatpush1.bf16.msra.mxu0 %v4087_v38  ;;  %v3280_v45 = vpack.c.bf16 %v829_v42, %v829_v42  ;;  %v1338_v8 = vpack.c.bf16 %v828_v40, %v832_v6  ;;  %v4146_v38 = vld [vmem:[%s5362_s6 + $0xe8] sm:$0xff]  }
 0x120   : > { %1526 = vmatprep.subr.bf16.mxu0 %v4095_v41  ;;  %v1339_v48 = vpack.c.bf16 %v829_v42, %v833_v44  ;;  %v4148_v40 = vld [vmem:[%s5362_s6 + $0xa8] sm:$0xff]   ;;  %v4150_v42 = vld [vmem:[%s5362_s6 + $0xf0] sm:$0xff]  }
 0x121   : > { %3281 = vmatprep.mubr.msk.bf16.mxu1 %vm3279_vm3, %v3280_v45  ;;  %v1343_v12 = vshll.u32 %v1338_v8, 16  ;;  %v1341_v14 = vshrl.u32 %v1338_v8, 16  ;;  %v4149_v41 = vld [vmem:[%s5362_s6 + $0x128] sm:$0xff]   ;;  %v4152_v44 = vld [vmem:[%s5362_s6 + $0xb0] sm:$0xff]  }
 0x122   : > { %3286 = vmatmul.mubr.msk.bf16.vlgmr.msra.gmra.mrb[12].mxu1 %vm3279_vm3, %v3285_v43  ;;  %v1348_v49 = vshrl.u32 %v1339_v48, 16  ;;  %v1350_v50 = vshll.u32 %v1339_v48, 16  ;;  %v4151_v43 = vld [vmem:[%s5362_s6 + $0x170] sm:$0xff]   ;;  %v4156_v48 = vld [vmem:[%s5362_s6 + $0xb8] sm:$0xff]  }
 0x123   : > { %1527 = vmatpush1.bf16.msra.mxu0 %v4093_v46  ;;  %v1345_v15 = vrot.slane %v1343_v12, 1  ;;  %3712 = vmatpush3.bf16.msra.mxu1 %v4128_v19  ;;  %v4153_v45 = vld [vmem:[%s5362_s6 + $0x130] sm:$0xff]   ;;  %v4154_v46 = vld [vmem:[%s5362_s6 + $0xf8] sm:$0xff]   ;;  %v4162_v19 = vld [vmem:[%s5362_s6 + $0x48] sm:$0xff]  }
 0x124   : > { %1528 = vmatprep.subr.bf16.mxu0 %v4098_v47  ;;  %v1352_v53 = vrot.slane %v1350_v50, 1  ;;  %3713 = vmatprep.subr.bf16.mxu1 %v4130_v21  ;;  %v4155_v47 = vld [vmem:[%s5362_s6 + $0x178] sm:$0xff]   ;;  %v4158_v50 = vld [vmem:[%s5362_s6 + $0x40] sm:$0xff]  }
 0x125   : > { %v1346_v16 = vor.u32 %v1345_v15, %v1341_v14 }
 0x126   : > { %v1353_v54 = vor.u32 %v1352_v53, %v1348_v49  ;;  %v4157_v49 = vld [vmem:[%s5362_s6 + $0x138] sm:$0xff]  }
 0x127   : > { %1529 = vmatpush1.bf16.msra.mxu0 %v4096_v51  ;;  %3714 = vmatpush3.bf16.msra.mxu1 %v4132_v23  ;;  %v4159_v51 = vld [vmem:[%s5362_s6 + $0x240] sm:$0xff]   ;;  %v4165_v23 = vld [vmem:[%s5362_s6 + $0x208] sm:$0xff]  }
 0x128   : > { %1530 = vmatprep.subr.bf16.mxu0 %v4101_v52  ;;  %1548 = vmatprep.mubr.bf16.mxu0 %v1353_v54 }
 0x129   : > { %3715 = vmatprep.subr.bf16.mxu1 %v4134_v25  ;;  %v4167_v25 = vld [vmem:[%s5362_s6 + $0x250] sm:$0xff]  }
 0x12b   : > { %1531 = vmatpush1.bf16.msra.mxu0 %v4099_v57  ;;  %3716 = vmatpush3.bf16.msra.mxu1 %v4136_v27  ;;  %v4169_v27 = vld [vmem:[%s5362_s6 + $0x210] sm:$0xff]  }
 0x12c   : > { %1532 = vmatprep.subr.bf16.mxu0 %v4104_v59  ;;  %3717 = vmatprep.subr.bf16.mxu1 %v4138_v29  ;;  %v4171_v29 = vld [vmem:[%s5362_s6 + $0x258] sm:$0xff]  }
 0x12f   : > { %1533 = vmatpush1.bf16.msra.mxu0 %v4102_v60  ;;  %3718 = vmatpush3.bf16.msra.mxu1 %v4140_v31  ;;  %v4173_v31 = vld [vmem:[%s5362_s6 + $0x218] sm:$0xff]  }
 0x130   : > { %1534 = vmatprep.subr.bf16.mxu0 %v4107_v61  ;;  %3719 = vmatprep.subr.bf16.mxu1 %v4142_v33  ;;  %v4175_v33 = vld [vmem:[%s5362_s6 + $0x260] sm:$0xff]  }
 0x133   : > { %1535 = vmatpush1.bf16.msra.mxu0 %v4105_v62  ;;  %3720 = vmatpush3.bf16.msra.mxu1 %v4144_v35  ;;  %v4177_v35 = vld [vmem:[%s5362_s6 + $0x220] sm:$0xff]  }
 0x134   : > { %1536 = vmatprep.subr.bf16.mxu0 %v4110_v63  ;;  %3721 = vmatprep.subr.bf16.mxu1 %v4146_v38  ;;  %v4179_v38 = vld [vmem:[%s5362_s6 + $0x268] sm:$0xff]  }
 0x137   : > { %1537 = vmatpush1.bf16.msra.mxu0 %v4108_v0  ;;  %3722 = vmatpush3.bf16.msra.mxu1 %v4148_v40  ;;  %v4181_v40 = vld [vmem:[%s5362_s6 + $0x228] sm:$0xff]  }
 0x138   : > { %1538 = vmatprep.subr.bf16.mxu0 %v4113_v1  ;;  %3723 = vmatprep.subr.bf16.mxu1 %v4150_v42  ;;  %v1559_v1 = vld [vmem:[%s5361_s5] sm:$0x3]  ;;  %v4183_v42 = vld [vmem:[%s5362_s6 + $0x270] sm:$0xff]  }
 0x13b   : > { %1539 = vmatpush1.bf16.msra.mxu0 %v4111_v2  ;;  %3724 = vmatpush3.bf16.msra.mxu1 %v4152_v44  ;;  %v1564_v2 = vrot.slane %v1559_v1, %v810_v56  ;;  %v4185_v44 = vld [vmem:[%s5362_s6 + $0x230] sm:$0xff]  }
 0x13c   : > { %1540 = vmatprep.subr.bf16.mxu0 %v4116_v3  ;;  %3725 = vmatprep.subr.bf16.mxu1 %v4154_v46  ;;  %v4187_v46 = vld [vmem:[%s5362_s6 + $0x278] sm:$0xff]  }
 0x13f   : > { %1541 = vmatpush1.bf16.msra.mxu0 %v4114_v4  ;;  %3726 = vmatpush3.bf16.msra.mxu1 %v4156_v48  ;;  %v1568_v4 = vrot.slane %v1559_v1, %v814_v58  ;;  %v4161_v58 = vld [vmem:[%s5362_s6 + $0x200] sm:$0xff]   ;;  %v4189_v48 = vld [vmem:[%s5362_s6 + $0x238] sm:$0xff]   ;;  %v4200_v1 = vld [vmem:[%s5362_s6 + $0x190] sm:$0xff]  }
 0x140   : > { %1542 = vmatprep.subr.bf16.mxu0 %v4119_v5  ;;  %3733 = vmatprep.subr.bf16.mxu1 %v4158_v50  ;;  %v4191_v50 = vld [vmem:[%s5362_s6 + $0x340] sm:$0xff]  }
 0x143   : > { %1543 = vmatpush1.bf16.msra.mxu0 %v4117_v7 }
 0x144   : > { %1544 = vmatprep.subr.bf16.mxu0 %v4122_v9 }
 0x147   : > { %1545 = vmatpush1.bf16.msra.mxu0 %v4120_v10 }
 0x148   : > { %1546 = vmatprep.subr.bf16.mxu0 %v4125_v11 }
 0x14b   : > { %1547 = vmatpush1.bf16.msra.mxu0 %v4123_v13 }
 0x14c   : > { %3755 = vmatprep.subr.bf16.mxu0 %v4127_v18 }
 0x14e   : > { %1549 = vmatmul.mubr.bf16.vlgmr.msra.gmra.mrb[16].mxu0 %v1346_v16 }
 0x14f   : > { %3756 = vmatpush3.bf16.msra.mxu0 %v4129_v20  ;;  %v4163_v20 = vld [vmem:[%s5362_s6 + $0x248] sm:$0xff]  }
 0x150   : > { %3757 = vmatprep.subr.bf16.mxu0 %v4131_v22  ;;  %v4164_v22 = vld [vmem:[%s5362_s6 + $0x8] sm:$0xff]  }
 0x153   : > { %3758 = vmatpush3.bf16.msra.mxu0 %v4133_v24  ;;  %v4166_v24 = vld [vmem:[%s5362_s6 + $0x50] sm:$0xff]  }
 0x154   : > { %3759 = vmatprep.subr.bf16.mxu0 %v4135_v26  ;;  %v4168_v26 = vld [vmem:[%s5362_s6 + $0x10] sm:$0xff]  }
 0x157   : > { %3760 = vmatpush3.bf16.msra.mxu0 %v4137_v28  ;;  %v4170_v28 = vld [vmem:[%s5362_s6 + $0x58] sm:$0xff]  }
 0x158   : > { %3761 = vmatprep.subr.bf16.mxu0 %v4139_v30  ;;  %v4172_v30 = vld [vmem:[%s5362_s6 + $0x18] sm:$0xff]  }
 0x15b   : > { %3762 = vmatpush3.bf16.msra.mxu0 %v4141_v32  ;;  %v4174_v32 = vld [vmem:[%s5362_s6 + $0x60] sm:$0xff]  }
 0x15c   : > { %3763 = vmatprep.subr.bf16.mxu0 %v4143_v34  ;;  %v4176_v34 = vld [vmem:[%s5362_s6 + $0x20] sm:$0xff]  }
 0x15f   : > { %3764 = vmatpush3.bf16.msra.mxu0 %v4145_v37  ;;  %v4178_v37 = vld [vmem:[%s5362_s6 + $0x68] sm:$0xff]  }
 0x160   : > { %3765 = vmatprep.subr.bf16.mxu0 %v4147_v39  ;;  %v4180_v39 = vld [vmem:[%s5362_s6 + $0x28] sm:$0xff]  }
 0x163   : > { %3766 = vmatpush3.bf16.msra.mxu0 %v4149_v41  ;;  %v4182_v41 = vld [vmem:[%s5362_s6 + $0x70] sm:$0xff]  }
 0x164   : > { %3767 = vmatprep.subr.bf16.mxu0 %v4151_v43  ;;  %v4184_v43 = vld [vmem:[%s5362_s6 + $0x30] sm:$0xff]  }
 0x167   : > { %3768 = vmatpush3.bf16.msra.mxu0 %v4153_v45  ;;  %v4186_v45 = vld [vmem:[%s5362_s6 + $0x78] sm:$0xff]  }
 0x168   : > { %3769 = vmatprep.subr.bf16.mxu0 %v4155_v47  ;;  %v4188_v47 = vld [vmem:[%s5362_s6 + $0x38] sm:$0xff]  }
 0x16b   : > { %3770 = vmatpush3.bf16.msra.mxu0 %v4157_v49  ;;  %v4190_v49 = vld [vmem:[%s5362_s6 + $0x1c0] sm:$0xff]  }
 0x16c   : > { %3799 = vmatprep.subr.bf16.mxu0 %v4159_v51  ;;  %v4192_v51 = vld [vmem:[%s5362_s6 + $0x180] sm:$0xff]  }
 0x1e1   : > { %v1097_v52 = vpop.f32.mrb[12].mxu0 }
 0x1e2   : > { %v1099_v53 = vpop.f32.mrb[13].mxu0 }
 0x1e3   : > { %v1101_v54 = vpop.f32.mrb[14].mxu0 }
 0x1e4   : > { %v1102_v57 = vpop.f32.mrb[15].mxu0 }
 0x1e5   : > { %v4194_v57 = vld [vmem:[%s5362_s6 + $0x1c8] sm:$0xff]  }
 0x1f5   : > { %v1298_v59 = vpop.f32.mrb[12].mxu1 }
 0x1f6   : > { %v1299_v60 = vadd.f32 %v1298_v59, %v1097_v52  ;;  %v1300_v61 = vpop.f32.mrb[13].mxu1  ;;  %v4195_v59 = vld [vmem:[%s5362_s6 + $0x348] sm:$0xff]  }
 0x1f7   : > { %v1301_v62 = vadd.f32 %v1300_v61, %v1099_v53  ;;  %v1302_v63 = vpop.f32.mrb[14].mxu1  ;;  %v4193_v53 = vld [vmem:[%s5362_s6 + $0x300] sm:$0xff]   ;;  %v4196_v61 = vld [vmem:[%s5362_s6 + $0x188] sm:$0xff]  }
 0x1f8   : > { %v1303_v0 = vpop.f32.mrb[15].mxu1  ;;  %v4198_v63 = vld [vmem:[%s5362_s6 + $0x1d0] sm:$0xff]  }
 0x1f9   : > { %v4199_v0 = vld [vmem:[%s5362_s6 + $0x350] sm:$0xff]  }
 0x221   : > { %v1550_v3 = vpop.f32.mrb[16].mxu0 }
 0x222   : > { %v1557_v5 = vadd.f32 %v1550_v3, %v1299_v60  ;;  %v1552_v6 = vpop.f32.mrb[17].mxu0  ;;  %v4202_v3 = vld [vmem:[%s5362_s6 + $0x1d8] sm:$0xff]  }
 0x223   : > { %v1558_v7 = vadd.f32 %v1552_v6, %v1301_v62  ;;  %v1554_v8 = vpop.f32.mrb[18].mxu0  ;;  %v4197_v62 = vld [vmem:[%s5362_s6 + $0x308] sm:$0xff]   ;;  %v4205_v6 = vld [vmem:[%s5362_s6 + $0x318] sm:$0xff]  }
 0x224   : > { %v1571_v9 = vadd.f32 %v1564_v2, %v1557_v5  ;;  %v1555_v10 = vpop.f32.mrb[19].mxu0  ;;  %v4201_v2 = vld [vmem:[%s5362_s6 + $0x310] sm:$0xff]   ;;  %v4204_v5 = vld [vmem:[%s5362_s6 + $0x198] sm:$0xff]   ;;  %v4207_v8 = vld [vmem:[%s5362_s6 + $0x360] sm:$0xff]  }
 0x225   : > { %v1572_v11 = vadd.f32 %v1568_v4, %v1558_v7  ;;  %v4203_v4 = vld [vmem:[%s5362_s6 + $0x358] sm:$0xff]   ;;  %v4206_v7 = vld [vmem:[%s5362_s6 + $0x1e0] sm:$0xff]  }
 0x226   : > { %v1573_v12 = vmax.f32 %v1571_v9, 0.0  ;;  %v4208_v9 = vld [vmem:[%s5362_s6 + $0x1a0] sm:$0xff]  }
 0x227   : > { %v1574_v13 = vmax.f32 %v1572_v11, 0.0  ;;  %v4209_v10 = vld [vmem:[%s5362_s6 + $0x320] sm:$0xff]   ;;  %v4210_v11 = vld [vmem:[%s5362_s6 + $0x1e8] sm:$0xff]  }
 0x228   : > { %v4977_v14 = vpack.c.bf16 %v1573_v12, %v1573_v12  ;;  %v4211_v12 = vld [vmem:[%s5362_s6 + $0x368] sm:$0xff]  }
 0x229   : > { %v4979_v15 = vpack.c.bf16 %v1574_v13, %v1574_v13  ;;  %v4212_v13 = vld [vmem:[%s5362_s6 + $0x1a8] sm:$0xff]  }
 0x22a   : > { %v4992_v17 = vshrl.u32 %v4977_v14, 16  ;;  %v1957_v18 = vrot.slane %v4977_v14, 1  ;;  %v2305_v52 = vrot.slane %v4977_v14, 2 }
 0x22b   : > { %v4982_v16 = vshrl.u32 %v4979_v15, 16  ;;  %v1958_v56 = vrot.slane %v4979_v15, 1  ;;  %v2306_v21 = vrot.slane %v4979_v15, 2  ;;  %v2654_v60 = vrot.slane %v4979_v15, 3 }
 0x22d   : > { %1778 = vmatprep.mubr.bf16.mxu1 %v4982_v16  ;;  %2089 = vmatprep.mubr.bf16.mxu0 %v1958_v56  ;;  %v2132_v54 = vrot.slane %v4982_v16, 1  ;;  %v4214_v56 = vld [vmem:[%s5362_s6 + $0x1f0] sm:$0xff]  }
 0x22e   : > { %1779 = vmatmul.mubr.bf16.vlgmr.msra.gmra.mrb[16].mxu1 %v4992_v17  ;;  %2090 = vmatmul.mubr.bf16.vlgmr.msra.gmra.mrb[20].mxu0 %v1957_v18  ;;  %v4217_v18 = vld [vmem:[%s5362_s6 + $0x330] sm:$0xff]  }
 0x22f   : > { %3734 = vmatpush3.bf16.msra.mxu1 %v4160_v55  ;;  %3800 = vmatpush3.bf16.msra.mxu0 %v4161_v58  ;;  %v4215_v55 = vld [vmem:[%s5362_s6 + $0x370] sm:$0xff]  }
 0x230   : > { %1914 = vmatprep.mubr.bf16.mxu1 %v4979_v15  ;;  %2437 = vmatprep.mubr.bf16.mxu0 %v2306_v21  ;;  %v4213_v15 = vld [vmem:[%s5362_s6 + $0x328] sm:$0xff]   ;;  %v4216_v58 = vld [vmem:[%s5362_s6 + $0x1b0] sm:$0xff]   ;;  %v4220_v21 = vld [vmem:[%s5362_s6 + $0x1b8] sm:$0xff]  }
 0x231   : > { %3735 = vmatprep.subr.bf16.mxu1 %v4162_v19  ;;  %3801 = vmatprep.subr.bf16.mxu0 %v4163_v20  ;;  %v4218_v19 = vld [vmem:[%s5362_s6 + $0x1f8] sm:$0xff]  }
 0x232   : > { %v4219_v20 = vld [vmem:[%s5362_s6 + $0x378] sm:$0xff]  }
 0x233   : > { %3736 = vmatpush3.bf16.msra.mxu1 %v4164_v22  ;;  %3802 = vmatpush3.bf16.msra.mxu0 %v4165_v23  ;;  %v4221_v22 = vld [vmem:[%s5362_s6 + $0x338] sm:$0xff]   ;;  %v4222_v23 = vld [vmem:[%s5362_s6 + $0x2c0] sm:$0xff]  }
 0x234   : > { %3737 = vmatprep.subr.bf16.mxu1 %v4166_v24  ;;  %3803 = vmatprep.subr.bf16.mxu0 %v4167_v25  ;;  %v4223_v24 = vld [vmem:[%s5362_s6 + $0x280] sm:$0xff]   ;;  %v2131_v25 = vrot.slane %v4992_v17, 1 }
 0x237   : > { %3738 = vmatpush3.bf16.msra.mxu1 %v4168_v26  ;;  %3804 = vmatpush3.bf16.msra.mxu0 %v4169_v27  ;;  %v4224_v26 = vld [vmem:[%s5362_s6 + $0x2c8] sm:$0xff]   ;;  %v2653_v27 = vrot.slane %v4977_v14, 3 }
 0x238   : > { %3739 = vmatprep.subr.bf16.mxu1 %v4170_v28  ;;  %3805 = vmatprep.subr.bf16.mxu0 %v4171_v29  ;;  %v2480_v28 = vrot.slane %v4982_v16, 2  ;;  %v4225_v29 = vld [vmem:[%s5362_s6 + $0x288] sm:$0xff]  }
 0x23b   : > { %3740 = vmatpush3.bf16.msra.mxu1 %v4172_v30  ;;  %3806 = vmatpush3.bf16.msra.mxu0 %v4173_v31  ;;  %v4226_v30 = vld [vmem:[%s5362_s6 + $0x2d0] sm:$0xff]   ;;  %v4228_v31 = vld [vmem:[%s5362_s6 + $0x2d8] sm:$0xff]  }
 0x23c   : > { %3741 = vmatprep.subr.bf16.mxu1 %v4174_v32  ;;  %3807 = vmatprep.subr.bf16.mxu0 %v4175_v33  ;;  %v4229_v32 = vld [vmem:[%s5362_s6 + $0x298] sm:$0xff]   ;;  %v4230_v33 = vld [vmem:[%s5362_s6 + $0x2e0] sm:$0xff]  }
 0x23f   : > { %3742 = vmatpush3.bf16.msra.mxu1 %v4176_v34  ;;  %3808 = vmatpush3.bf16.msra.mxu0 %v4177_v35  ;;  %v4231_v34 = vld [vmem:[%s5362_s6 + $0x2a0] sm:$0xff]   ;;  %v4232_v35 = vld [vmem:[%s5362_s6 + $0x2e8] sm:$0xff]  }
 0x240   : > { %3743 = vmatprep.subr.bf16.mxu1 %v4178_v37  ;;  %3809 = vmatprep.subr.bf16.mxu0 %v4179_v38  ;;  %v4233_v37 = vld [vmem:[%s5362_s6 + $0x2a8] sm:$0xff]   ;;  %v4234_v38 = vld [vmem:[%s5362_s6 + $0x2f0] sm:$0xff]  }
 0x243   : > { %3744 = vmatpush3.bf16.msra.mxu1 %v4180_v39  ;;  %3810 = vmatpush3.bf16.msra.mxu0 %v4181_v40  ;;  %v4235_v39 = vld [vmem:[%s5362_s6 + $0x2b0] sm:$0xff]   ;;  %v4236_v40 = vld [vmem:[%s5362_s6 + $0x2f8] sm:$0xff]  }
 0x244   : > { %3745 = vmatprep.subr.bf16.mxu1 %v4182_v41  ;;  %3811 = vmatprep.subr.bf16.mxu0 %v4183_v42  ;;  %v4237_v41 = vld [vmem:[%s5362_s6 + $0x2b8] sm:$0xff]   ;;  %v4238_v42 = vld [vmem:[%s5362_s6 + $0x3c0] sm:$0xff]  }
 0x247   : > { %3746 = vmatpush3.bf16.msra.mxu1 %v4184_v43  ;;  %3812 = vmatpush3.bf16.msra.mxu0 %v4185_v44  ;;  %v4239_v43 = vld [vmem:[%s5362_s6 + $0x380] sm:$0xff]   ;;  %v2479_v44 = vrot.slane %v4992_v17, 2 }
 0x248   : > { %3747 = vmatprep.subr.bf16.mxu1 %v4186_v45  ;;  %3813 = vmatprep.subr.bf16.mxu0 %v4187_v46  ;;  %v4240_v45 = vld [vmem:[%s5362_s6 + $0x3c8] sm:$0xff]   ;;  %v2828_v46 = vrot.slane %v4982_v16, 3  ;;  %v4244_v16 = vld [vmem:[%s5362_s6 + $0x3d8] sm:$0xff]  }
 0x24b   : > { %3748 = vmatpush3.bf16.msra.mxu1 %v4188_v47  ;;  %3814 = vmatpush3.bf16.msra.mxu0 %v4189_v48  ;;  %v4241_v47 = vld [vmem:[%s5362_s6 + $0x388] sm:$0xff]   ;;  %v4242_v48 = vld [vmem:[%s5362_s6 + $0x3d0] sm:$0xff]  }
 0x24c   : > { %3777 = vmatprep.subr.bf16.mxu1 %v4190_v49  ;;  %3843 = vmatprep.subr.bf16.mxu0 %v4191_v50  ;;  %v4243_v49 = vld [vmem:[%s5362_s6 + $0x390] sm:$0xff]   ;;  %v4245_v50 = vld [vmem:[%s5362_s6 + $0x398] sm:$0xff]  }
 0x24e   : > { %1915 = vmatmul.mubr.bf16.vlgmr.msra.gmra.mrb[20].mxu1 %v4977_v14  ;;  %2438 = vmatmul.mubr.bf16.vlgmr.msra.gmra.mrb[24].mxu0 %v2305_v52  ;;  %v4227_v14 = vld [vmem:[%s5362_s6 + $0x290] sm:$0xff]   ;;  %v4247_v52 = vld [vmem:[%s5362_s6 + $0x3a0] sm:$0xff]  }
 0x24f   : > { %3778 = vmatpush3.bf16.msra.mxu1 %v4192_v51  ;;  %2263 = vmatprep.mubr.bf16.mxu1 %v2132_v54  ;;  %v4246_v51 = vld [vmem:[%s5362_s6 + $0x3e0] sm:$0xff]   ;;  %v4249_v54 = vld [vmem:[%s5362_s6 + $0x3a8] sm:$0xff]  }
 0x250   : > { %3844 = vmatpush3.bf16.msra.mxu0 %v4193_v53  ;;  %2785 = vmatprep.mubr.bf16.mxu0 %v2654_v60  ;;  %v4248_v53 = vld [vmem:[%s5362_s6 + $0x3e8] sm:$0xff]   ;;  %v4252_v60 = vld [vmem:[%s5362_s6 + $0x3f8] sm:$0xff]  }
 0x251   : > { %3779 = vmatprep.subr.bf16.mxu1 %v4194_v57  ;;  %3845 = vmatprep.subr.bf16.mxu0 %v4195_v59  ;;  %v4250_v57 = vld [vmem:[%s5362_s6 + $0x3f0] sm:$0xff]  }
 0x252   : > { %v4251_v59 = vld [vmem:[%s5362_s6 + $0x3b0] sm:$0xff]  }
 0x253   : > { %3780 = vmatpush3.bf16.msra.mxu1 %v4196_v61  ;;  %v4253_v61 = vld [vmem:[%s5362_s6 + $0x3b8] sm:$0xff]  }
 0x254   : > { %3846 = vmatpush3.bf16.msra.mxu0 %v4197_v62  ;;  %3781 = vmatprep.subr.bf16.mxu1 %v4198_v63  ;;  %v2827_v62 = vrot.slane %v4992_v17, 3  ;;  %v4254_v63 = vld [vmem:[%s5364_s8] sm:$0xff]  }
 0x255   : > { %3847 = vmatprep.subr.bf16.mxu0 %v4199_v0 }
 0x257   : > { %3782 = vmatpush3.bf16.msra.mxu1 %v4200_v1 }
 0x258   : > { %3848 = vmatpush3.bf16.msra.mxu0 %v4201_v2  ;;  %3783 = vmatprep.subr.bf16.mxu1 %v4202_v3  ;;  %v4255_v2 = vld [vmem:[%s5364_s8 + $0x8] sm:$0xff]  }
 0x259   : > { %3849 = vmatprep.subr.bf16.mxu0 %v4203_v4 }
 0x25b   : > { %3784 = vmatpush3.bf16.msra.mxu1 %v4204_v5 }
 0x25c   : > { %3850 = vmatpush3.bf16.msra.mxu0 %v4205_v6  ;;  %3785 = vmatprep.subr.bf16.mxu1 %v4206_v7 }
 0x25d   : > { %3851 = vmatprep.subr.bf16.mxu0 %v4207_v8 }
 0x25f   : > { %3786 = vmatpush3.bf16.msra.mxu1 %v4208_v9 }
 0x260   : > { %3852 = vmatpush3.bf16.msra.mxu0 %v4209_v10  ;;  %3787 = vmatprep.subr.bf16.mxu1 %v4210_v11  ;;  %v4256_v10 = vld [vmem:[%s5364_s8 + $0x10] sm:$0xff]   ;;  %v4257_v11 = vld [vmem:[%s5364_s8 + $0x18] sm:$0xff]  }
 0x261   : > { %3853 = vmatprep.subr.bf16.mxu0 %v4211_v12 }
 0x263   : > { %3788 = vmatpush3.bf16.msra.mxu1 %v4212_v13 }
 0x264   : > { %3854 = vmatpush3.bf16.msra.mxu0 %v4213_v15  ;;  %3789 = vmatprep.subr.bf16.mxu1 %v4214_v56 }
 0x265   : > { %3855 = vmatprep.subr.bf16.mxu0 %v4215_v55 }
 0x267   : > { %3790 = vmatpush3.bf16.msra.mxu1 %v4216_v58 }
 0x268   : > { %3856 = vmatpush3.bf16.msra.mxu0 %v4217_v18  ;;  %3791 = vmatprep.subr.bf16.mxu1 %v4218_v19 }
 0x269   : > { %3857 = vmatprep.subr.bf16.mxu0 %v4219_v20 }
 0x26b   : > { %3792 = vmatpush3.bf16.msra.mxu1 %v4220_v21 }
 0x26c   : > { %3858 = vmatpush3.bf16.msra.mxu0 %v4221_v22  ;;  %3821 = vmatprep.subr.bf16.mxu1 %v4222_v23 }
 0x26d   : > { %3892 = vmatprep.subr.bf16.mxu0 %v4323_v36 }
 0x26e   : > { %2264 = vmatmul.mubr.bf16.vlgmr.msra.gmra.mrb[24].mxu1 %v2131_v25 }
 0x26f   : > { %2786 = vmatmul.mubr.bf16.vlgmr.msra.gmra.mrb[28].mxu0 %v2653_v27  ;;  %3822 = vmatpush3.bf16.msra.mxu1 %v4223_v24 }
 0x270   : > { %2611 = vmatprep.mubr.bf16.mxu1 %v2480_v28  ;;  %3823 = vmatprep.subr.bf16.mxu1 %v4224_v26 }
 0x271   : > { %3893 = vmatpush3.bf16.msra.mxu0 %v4254_v63  ;;  %3900 = vmatprep.mubr.msk.bf16.mxu0 %vm4324_vm4, %v4323_v36 }
 0x272   : > { %3894 = vmatprep.subr.bf16.mxu0 %v4323_v36 }
 0x273   : > { %3824 = vmatpush3.bf16.msra.mxu1 %v4225_v29 }
 0x274   : > { %3825 = vmatprep.subr.bf16.mxu1 %v4226_v30 }
 0x275   : > { %3895 = vmatpush3.bf16.msra.mxu0 %v4255_v2 }
 0x276   : > { %3896 = vmatprep.subr.bf16.mxu0 %v4323_v36 }
 0x277   : > { %3826 = vmatpush3.bf16.msra.mxu1 %v4227_v14 }
 0x278   : > { %3827 = vmatprep.subr.bf16.mxu1 %v4228_v31 }
 0x279   : > { %3897 = vmatpush3.bf16.msra.mxu0 %v4256_v10 }
 0x27a   : > { %3898 = vmatprep.subr.bf16.mxu0 %v4323_v36 }
 0x27b   : > { %3828 = vmatpush3.bf16.msra.mxu1 %v4229_v32 }
 0x27c   : > { %3829 = vmatprep.subr.bf16.mxu1 %v4230_v33 }
 0x27d   : > { %3899 = vmatpush3.bf16.msra.mxu0 %v4257_v11 }
 0x27f   : > { %3830 = vmatpush3.bf16.msra.mxu1 %v4231_v34 }
 0x280   : > { %3831 = vmatprep.subr.bf16.mxu1 %v4232_v35 }
 0x283   : > { %3832 = vmatpush3.bf16.msra.mxu1 %v4233_v37 }
 0x284   : > { %3833 = vmatprep.subr.bf16.mxu1 %v4234_v38 }
 0x287   : > { %3834 = vmatpush3.bf16.msra.mxu1 %v4235_v39 }
 0x288   : > { %3835 = vmatprep.subr.bf16.mxu1 %v4236_v40 }
 0x28b   : > { %3836 = vmatpush3.bf16.msra.mxu1 %v4237_v41 }
 0x28c   : > { %3865 = vmatprep.subr.bf16.mxu1 %v4238_v42 }
 0x28e   : > { %2612 = vmatmul.mubr.bf16.vlgmr.msra.gmra.mrb[28].mxu1 %v2479_v44 }
 0x28f   : > { %3866 = vmatpush3.bf16.msra.mxu1 %v4239_v43  ;;  %2959 = vmatprep.mubr.bf16.mxu1 %v2828_v46  ;;  %v2968_v46 = vld [vmem:[%s5363_s7] sm:$0x1] }
 0x290   : > { %3867 = vmatprep.subr.bf16.mxu1 %v4240_v45 }
 0x293   : > { %3868 = vmatpush3.bf16.msra.mxu1 %v4241_v47 }
 0x294   : > { %3869 = vmatprep.subr.bf16.mxu1 %v4242_v48 }
 0x297   : > { %3870 = vmatpush3.bf16.msra.mxu1 %v4243_v49 }
 0x298   : > { %3871 = vmatprep.subr.bf16.mxu1 %v4244_v16 }
 0x29b   : > { %3872 = vmatpush3.bf16.msra.mxu1 %v4245_v50 }
 0x29c   : > { %3873 = vmatprep.subr.bf16.mxu1 %v4246_v51  ;;  %v2980_v51 = vld [vmem:[%s5365_s9] sm:$0x1] }
 0x29f   : > { %3874 = vmatpush3.bf16.msra.mxu1 %v4247_v52 }
 0x2a0   : > { %3875 = vmatprep.subr.bf16.mxu1 %v4248_v53 }
 0x2a3   : > { %3876 = vmatpush3.bf16.msra.mxu1 %v4249_v54 }
 0x2a4   : > { %3877 = vmatprep.subr.bf16.mxu1 %v4250_v57 }
 0x2a7   : > { %3878 = vmatpush3.bf16.msra.mxu1 %v4251_v59 }
 0x2a8   : > { %3879 = vmatprep.subr.bf16.mxu1 %v4252_v60 }
 0x2ab   : > { %3880 = vmatpush3.bf16.msra.mxu1 %v4253_v61 }
 0x2ae   : > { %2960 = vmatmul.mubr.bf16.vlgmr.msra.gmra.mrb[32].mxu1 %v2827_v62 }
 0x301   : > { %v3727_v0 = vpop.f32.mrb[16].mxu1  ;;  %v3771_v1 = vpop.f32.mrb[20].mxu0 }
 0x302   : > { %v3728_v3 = vpop.f32.mrb[17].mxu1  ;;  %v3772_v4 = vpop.f32.mrb[21].mxu0 }
 0x303   : > { %v3729_v5 = vadd.f32 %v3728_v3, %v3727_v0  ;;  %v3773_v6 = vadd.f32 %v3772_v4, %v3771_v1  ;;  %v3730_v7 = vpop.f32.mrb[18].mxu1  ;;  %v3774_v17 = vpop.f32.mrb[22].mxu0 }
 0x304   : > { %v3731_v8 = vpop.f32.mrb[19].mxu1  ;;  %v3775_v9 = vpop.f32.mrb[23].mxu0 }
 0x321   : > { %v3749_v12 = vpop.f32.mrb[20].mxu1  ;;  %v3815_v13 = vpop.f32.mrb[24].mxu0 }
 0x322   : > { %v3750_v15 = vpop.f32.mrb[21].mxu1  ;;  %v3816_v56 = vpop.f32.mrb[25].mxu0 }
 0x323   : > { %v3751_v55 = vadd.f32 %v3750_v15, %v3749_v12  ;;  %v3817_v58 = vadd.f32 %v3816_v56, %v3815_v13  ;;  %v3752_v18 = vpop.f32.mrb[22].mxu1  ;;  %v3818_v19 = vpop.f32.mrb[26].mxu0 }
 0x324   : > { %v3753_v20 = vpop.f32.mrb[23].mxu1  ;;  %v3819_v21 = vpop.f32.mrb[27].mxu0 }
 0x325   : > { %v1917_v22 = vadd.f32 %v3751_v55, %v3729_v5 }
 0x327   : > { %v2097_v23 = vadd.f32 %v3773_v6, %v1917_v22 }
 0x341   : > { %v3793_v24 = vpop.f32.mrb[24].mxu1 }
 0x342   : > { %v3859_v25 = vpop.f32.mrb[28].mxu0  ;;  %v3794_v26 = vpop.f32.mrb[25].mxu1 }
 0x343   : > { %v3795_v27 = vadd.f32 %v3794_v26, %v3793_v24  ;;  %v3860_v28 = vpop.f32.mrb[29].mxu0  ;;  %v3796_v29 = vpop.f32.mrb[26].mxu1 }
 0x344   : > { %v3861_v30 = vadd.f32 %v3860_v28, %v3859_v25  ;;  %v3862_v36 = vpop.f32.mrb[30].mxu0  ;;  %v3797_v14 = vpop.f32.mrb[27].mxu1 }
 0x345   : > { %v2271_v31 = vadd.f32 %v3795_v27, %v2097_v23  ;;  %v3863_v32 = vpop.f32.mrb[31].mxu0 }
 0x347   : > { %v2445_v33 = vadd.f32 %v3817_v58, %v2271_v31 }
 0x361   : > { %v3837_v34 = vpop.f32.mrb[28].mxu1 }
 0x362   : > { %v3838_v35 = vpop.f32.mrb[29].mxu1 }
 0x363   : > { %v3839_v37 = vadd.f32 %v3838_v35, %v3837_v34  ;;  %v3840_v38 = vpop.f32.mrb[30].mxu1 }
 0x364   : > { %v3841_v39 = vpop.f32.mrb[31].mxu1 }
 0x365   : > { %v2619_v40 = vadd.f32 %v3839_v37, %v2445_v33 }
 0x367   : > { %v2793_v41 = vadd.f32 %v3861_v30, %v2619_v40 }
 0x381   : > { %v3881_v42 = vpop.f32.mrb[32].mxu1 }
 0x382   : > { %v3882_v43 = vpop.f32.mrb[33].mxu1 }
 0x383   : > { %v3883_v44 = vadd.f32 %v3882_v43, %v3881_v42  ;;  %v3884_v45 = vpop.f32.mrb[34].mxu1 }
 0x384   : > { %v3885_v47 = vpop.f32.mrb[35].mxu1 }
 0x385   : > { %v2967_v48 = vadd.f32 %v3883_v44, %v2793_v41 }
 0x387   : > { %v2969_v49 = vadd.f32 %v2968_v46, %v2967_v48 }
 0x389   : > { %v2970_v16 = vmax.f32 %v2969_v49, 0.0 }
 0x38b   : > { %v2979_v50 = vpack.c.bf16 %v2970_v16, %v2970_v16 }
 0x38d   : > { %3901 = vmatmul.mubr.msk.bf16.vlgmr.msra.gmra.mrb[32].mxu0 %vm439_vm1, %v2979_v50 }
 0x460   : > { %v3042_v52 = vpop.f32.mrb[32].mxu0 }
 0x461   : > { %v3043_v53 = vadd.f32 %v3042_v52, %v2980_v51  ;;  %v3902_v54 = vpop.f32.mrb[33].mxu0 }
 0x462   : > { %v3045_v57 = vpop.f32.mrb[34].mxu0 }
 0x463   : > { %3048 = vst [vmem:[%s362_s12] sm:$0x1] %v3043_v53  ;;  %v3903_v59 = vpop.f32.mrb[35].mxu0 }
 0x464   : > { %4271 = shalt.err (!%p4268_p3)
}
 0x465   : > { %s4272_s29 = scalar_lea.hbm %s5314_s21, 16  ;;  %s4276_s11 = scalar_lea.hbm %s5366_s10, 32 }
 0x466   : > { %p4273_p4 = scmp.ne.s32.totalorder %s5314_s21, %s4272_s29  ;;  %p4277_p9 = scmp.lt.u32.totalorder %s5314_s21, %s5366_s10 }
 0x467   : > { %p4278_p10 = scmp.lt.u32.totalorder %s4276_s11, %s4272_s29  ;;  %p4280_p12 = scmp.lt.u32.totalorder %s4272_s29, %s5314_s21 }
 0x468   : > { %p4274_p7 = pnand %p4273_p4, %p4419_p5 }
 0x469   : > { %p4279_p11 = por %p4278_p10, %p4277_p9 }
 0x46a   : > { %p4275_p8 = pneg %p4274_p7 }
 0x46b   : > { %p4281_p13 = por %p4280_p12, %p4279_p11 }
 0x46d   : > { %p4282_p0 = pnand %p4281_p13, %p4275_p8 }
 0x46f   : > { %4285 = shalt.err (!%p4282_p0)
}
 0x470   : > { %3904 = dma.vmem_to_hbm [thread:$0]  (%p4419_p5), %s5316_s15, 16, %s5314_s21, %s3050_s25  }
 0x471 PF: > { %p3910_p1 = scmp.ge.s32.totalorder %s4320_s16, 2  ;;  %s3074_s20 = sand.u32 1, %s4308_s13  }
 0x472   : > { %s3075_s17 = scalar_lea.sflag [#allocation3], %s3074_s20 }
 0x473   : > { %p3907_p2 = pnand %p3910_p1, %p4423_p6 }
 0x475   : > { %4303 = dma.done.wait (!%p3907_p2), %s3075_s17, 16  }
 0x476   : > { %4305 = vsyncadd (!%p3907_p2), %s3075_s17, 4294967280  ;;  %s5374_s26 = sld [smem:[#allocation5_spill]]  ;;  %s5375_s15 = sld [smem:[#allocation6_spill]] }
 0x477   : > { %p20_p3 = scmp.ge.s32.totalorder %s4406_s19, 4   ;;  %s5376_s13 = smov %s4312_s14 }
 0x478   : > { %s5378_s16 = smov %s4406_s19 }
 0x479   :  { %22 = sbr.rel (!%p20_p3) target bundleno = 3 (0x3), region = 109 }
 0x47c   : > { %s5377_s14 = smov %s5374_s26 }
 0x480   :  { %3079 = vsyncpa [#allocation3], 1 }
 0x481   :  { %3081 = vsyncpa [#allocation3 + $0x1], 1 }

</bundles_post_ra>
